<compile_context>
chip_gen: v7x
topology: tpu7x:2x2x1
jax: 0.10.0
libtpu: 0.0.40
codegen_flags: <defaults>
</compile_context>

<pallas_src>
import functools

import jax
import jax.numpy as jnp
import numpy as np
from jax.experimental import pallas as pl
from jax.experimental.pallas import tpu as pltpu

GATE_CHANNELS = 16
M_MIN = 1e-7


def _scale_atten_kernel(mlp_ref, conv_ref, mask_ref, scal_ref, x_ref,
                        xout_ref, ca_ref, sa_ref, *, W):
    # Per-grid-step shapes:
    #   x_ref    : (TB, C, HW)   lane-dense images (TB images per step)
    #   mlp_ref  : (C, 3)        columns = [w1, group-mean(w2), 3*group-mean(b2)]
    #   conv_ref : (16, C)       folded 3x3 conv taps (rows 0..8 used, rest 0)
    #   mask_ref : (16, HW)      precomputed source-validity masks per tap
    #   scal_ref : (3,) SMEM     [mlp_b1, folded_bn_bias, conv2_w]
    TB, C, HW = x_ref.shape
    x = x_ref[...].astype(jnp.float32)                       # (TB, C, HW)

    # ------------------------------ ChannelGate ------------------------------
    w1 = mlp_ref[:, 0:1][None, :, :]                         # (1, C, 1)
    w2g = mlp_ref[:, 1:2][None, :, :]                        # group-mean folded
    b2g3 = mlp_ref[:, 2:3][None, :, :]                       # 3 * group-mean(b2)
    b1 = scal_ref[0]

    max_p = jnp.max(x, axis=2, keepdims=True)                # (TB, C, 1)
    avg_p = jnp.mean(x, axis=2, keepdims=True)
    # numerically stable softpool (identical to the exp(x) form w/o overflow)
    ex = jnp.exp(x - max_p)
    sp_p = (jnp.sum(ex * x, axis=2, keepdims=True)
            / jnp.sum(ex, axis=2, keepdims=True))            # (TB, C, 1)

    def hidden(p):                                           # Linear(C,1) -> ReLU
        return jnp.maximum(jnp.sum(p * w1, axis=1, keepdims=True) + b1, 0.0)

    hid_sum = hidden(avg_p) + hidden(max_p) + hidden(sp_p)   # (TB, 1, 1)
    # Linear(1,C)+bias then the (B,4,4) group-of-4 channel mean; both linear,
    # so they are pre-folded into w2g / b2g3 in the wrapper.
    scale = jax.nn.sigmoid(hid_sum * w2g + b2g3)             # (TB, C, 1)

    ca_ref[...] = scale.astype(ca_ref.dtype)                 # compact ca_atten
    x_cg = x * scale                                         # gated x (= residual)

    # ---- SpatialAtten: 3x3 conv (C->1) + folded BN + ReLU, then 1x1 + ReLU ----
    bn_bias = scal_ref[1]
    conv2_w = scal_ref[2]

    # MXU: batched per-tap channel contraction (TB,16,C)@(TB,C,HW) -> (TB,16,HW)
    convb = jnp.broadcast_to(conv_ref[...][None, :, :], (TB,) + conv_ref.shape)
    taps = jnp.einsum('bkc,bcp->bkp', convb, x_cg,
                      preferred_element_type=jnp.float32)

    # Combine the 9 taps with lane rolls.  The masks (precomputed in the
    # wrapper) zero source pixels whose shifted destination would wrap across
    # an image edge, so a flat roll over HW is exact.
    acc = taps[:, 4:5, :]                                    # centre tap: shift 0
    for dy in range(3):
        for dx in range(3):
            t = dy * 3 + dx
            if t == 4:
                continue
            shift = (dy - 1) * W + (dx - 1)
            tap = taps[:, t:t + 1, :] * mask_ref[t:t + 1, :]  # (TB, 1, HW)
            acc = acc + pltpu.roll(tap, shift=(-shift) % HW, axis=2)

    z1 = jnp.maximum(acc + bn_bias, 0.0)                     # conv1 + BN + ReLU
    z2 = jnp.maximum(z1 * conv2_w, 0.0)                      # conv2 (1x1) + ReLU

    # ------------------------------ MapF, ker=(H, W) --------------------------
    # z2 >= 0 after the ReLU, so |z2| == z2 and both pools coincide; MapF
    # collapses exactly to a = (z2/(max+M))^2 * (a_ + 1).
    xm = jnp.max(z2, axis=2, keepdims=True)                  # (TB, 1, 1)
    xa = jnp.mean(z2, axis=2, keepdims=True)
    a_ = ((xm + xa) / (xm - xa + M_MIN) + xm / (xa + M_MIN)) * 0.5 + 1.0
    r = z2 * pl.reciprocal(xm + M_MIN, approx=True)
    sa = jax.nn.sigmoid(r * r * (a_ + 1.0))                  # (TB, 1, HW)

    sa_ref[...] = sa.astype(sa_ref.dtype)                    # compact sa_atten
    xout_ref[...] = (x_cg * (sa + 1.0)).astype(xout_ref.dtype)


def _tap_source_masks(H, W):
    """(16, H*W) 0/1 masks: mask[t, q]==1 iff source pixel q maps to a valid
    in-bounds destination for tap t (t = dy*3+dx) under the flattened roll."""
    rows = np.arange(H)[:, None]
    cols = np.arange(W)[None, :]
    m = np.zeros((16, H * W), np.float32)
    for dy in range(3):
        for dx in range(3):
            sh, sw = dy - 1, dx - 1
            ok = ((rows >= sh) & (rows <= H - 1 + sh)
                  & (cols >= sw) & (cols <= W - 1 + sw))
            m[dy * 3 + dx] = ok.astype(np.float32).reshape(-1)
    return jnp.asarray(m)


def _pick_images_per_step(B, C, HW):
    # Keep the live working set around <= 24 MiB (~9 f32 (TB,C,HW) slabs incl.
    # double-buffered I/O) so it fits every chip with the 48 MiB scoped limit;
    # prefer TB a multiple of 8 for sublane density when B > 8.
    budget_tb = max(1, (24 << 20) // (9 * C * HW * 4))
    if B <= 8:
        return B
    return int(min(128, max(8, (min(budget_tb, B) // 8) * 8)))


def scale_atten_block_softpool(x, params, *, expand_attention=True):
    """Forward pass of Scale_atten_block_softpool -> (x_out, ca_atten, sa_atten).

    With expand_attention=True (module parity) ca/sa are broadcast to
    (B, C, H, W); pass False to get compact (B,C,1,1)/(B,1,H,W) and skip the
    extra HBM writeback those broadcasts cost."""
    B, C, H, W = x.shape
    assert C == GATE_CHANNELS, "module requires gate_channels == 16"
    HW = H * W
    out_dtype = x.dtype

    # ----------------- fold parameters (wrapper-side, once) -----------------
    w1 = jnp.asarray(params["mlp_w1"], jnp.float32).reshape(C)
    w2 = jnp.asarray(params["mlp_w2"], jnp.float32).reshape(C)
    b2 = jnp.asarray(params["mlp_b2"], jnp.float32).reshape(C)
    # the (B,4,4) group-of-4 channel mean is linear -> fold into MLP layer 2
    w2g = jnp.repeat(jnp.mean(w2.reshape(4, 4), axis=1), 4)
    b2g3 = 3.0 * jnp.repeat(jnp.mean(b2.reshape(4, 4), axis=1), 4)
    mlpw = jnp.stack([w1, w2g, b2g3], axis=1)                 # (C, 3)

    # fold BatchNorm2d (eval mode) into the 3x3 conv
    eps = 1e-5
    s = params["bn_gamma"] / jnp.sqrt(params["bn_var"] + eps)
    bn_bias = params["bn_beta"] - params["bn_mean"] * s
    w_eff = jnp.asarray(params["conv1_w"], jnp.float32) * s   # (C, 3, 3)
    convw = jnp.transpose(w_eff, (1, 2, 0)).reshape(9, C)     # row t = dy*3+dx
    convw = jnp.concatenate([convw, jnp.zeros((7, C), jnp.float32)], axis=0)

    scalars = jnp.array([params["mlp_b1"], bn_bias, params["conv2_w"]],
                        jnp.float32)
    masks = _tap_source_masks(H, W)                           # (16, HW)

    # ----------------- batch blocking: TB images per grid step --------------
    TB = _pick_images_per_step(B, C, HW)
    B_pad = ((B + TB - 1) // TB) * TB
    x3 = x.reshape(B, C, HW)                                  # lane-dense spatial
    if B_pad != B:
        x3 = jnp.concatenate(
            [x3, jnp.zeros((B_pad - B, C, HW), x3.dtype)], axis=0)

    kernel = functools.partial(_scale_atten_kernel, W=W)

    grid_spec = pltpu.PrefetchScalarGridSpec(
        num_scalar_prefetch=0,
        grid=(B_pad // TB,),
        in_specs=[
            pl.BlockSpec((C, 3), lambda i: (0, 0)),           # MLP params
            pl.BlockSpec((16, C), lambda i: (0, 0)),          # folded conv taps
            pl.BlockSpec((16, HW), lambda i: (0, 0)),         # tap source masks
            pl.BlockSpec((3,), lambda i: (0,),
                         memory_space=pltpu.MemorySpace.SMEM),  # scalars
            pl.BlockSpec((TB, C, HW), lambda i: (i, 0, 0)),   # x
        ],
        out_specs=(
            pl.BlockSpec((TB, C, HW), lambda i: (i, 0, 0)),   # x_out
            pl.BlockSpec((TB, C, 1), lambda i: (i, 0, 0)),    # ca (compact)
            pl.BlockSpec((TB, 1, HW), lambda i: (i, 0, 0)),   # sa (compact)
        ),
    )

    out_shape = (
        jax.ShapeDtypeStruct((B_pad, C, HW), out_dtype),
        jax.ShapeDtypeStruct((B_pad, C, 1), jnp.float32),
        jax.ShapeDtypeStruct((B_pad, 1, HW), jnp.float32),
    )

    esize = jnp.dtype(out_dtype).itemsize
    cost = pl.CostEstimate(
        flops=int(B_pad * C * HW * 60),
        transcendentals=int(B_pad * HW * (C + 2)),
        bytes_accessed=int(B_pad * (2 * esize * C * HW + 4 * (C + HW))),
    )

    x_out, ca_c, sa_c = pl.pallas_call(
        kernel,
        out_shape=out_shape,
        grid_spec=grid_spec,
        compiler_params=pltpu.CompilerParams(
            dimension_semantics=("parallel",),
            vmem_limit_bytes=48 * 1024 * 1024),
        cost_estimate=cost,
    )(mlpw, convw, masks, scalars, x3)

    x_out = x_out[:B].reshape(B, C, H, W)
    ca = ca_c[:B].reshape(B, C, 1, 1)
    sa = sa_c[:B].reshape(B, 1, H, W)
    if expand_attention:          # module parity; costs an extra HBM pass
        ca = jnp.broadcast_to(ca, (B, C, H, W))
        sa = jnp.broadcast_to(sa, (B, C, H, W))
    return x_out, ca, sa


# ----------------------------- numpy reference -----------------------------
def reference_forward(x, p):
    x = np.asarray(x, np.float32)
    B, C, H, W = x.shape
    w1 = np.asarray(p["mlp_w1"], np.float32)
    w2 = np.asarray(p["mlp_w2"], np.float32)
    b2 = np.asarray(p["mlp_b2"], np.float32)
    b1 = float(p["mlp_b1"])

    def mlp(q):                                              # q: (B, C)
        hid = np.maximum(q @ w1 + b1, 0.0)                   # (B,)
        return hid[:, None] * w2[None, :] + b2[None, :]

    avg_p = x.mean(axis=(2, 3))
    max_p = x.max(axis=(2, 3))
    ex = np.exp(x)
    sp_p = (ex * x).sum(axis=(2, 3)) / ex.sum(axis=(2, 3))
    cas = mlp(avg_p) + mlp(max_p) + mlp(sp_p)
    gm = cas.reshape(B, 4, 4).mean(axis=2, keepdims=True)
    avg_w = np.broadcast_to(gm, (B, 4, 4)).reshape(B, C)
    scale = 1.0 / (1.0 + np.exp(-avg_w))
    ca = np.broadcast_to(scale[:, :, None, None], (B, C, H, W))
    x_cg = x * ca

    conv_w = np.asarray(p["conv1_w"], np.float32)
    s = float(p["bn_gamma"]) / np.sqrt(float(p["bn_var"]) + 1e-5)
    t = float(p["bn_beta"]) - float(p["bn_mean"]) * s
    xpad = np.pad(x_cg, ((0, 0), (0, 0), (1, 1), (1, 1)))
    z1 = np.zeros((B, H, W), np.float32)
    for dy in range(3):
        for dx in range(3):
            z1 = z1 + np.einsum("bchw,c->bhw",
                                xpad[:, :, dy:dy + H, dx:dx + W],
                                conv_w[:, dy, dx])
    z1 = np.maximum(z1 * s + t, 0.0)
    z2 = np.maximum(z1 * float(p["conv2_w"]), 0.0)

    x0 = np.abs(z2)
    x1 = (x0 + z2) * 0.5
    m_x = x0.max(axis=(1, 2), keepdims=True)
    xm = x1.max(axis=(1, 2), keepdims=True)
    xa = x1.mean(axis=(1, 2), keepdims=True)
    a_ = ((xm + xa) / (xm - xa + M_MIN) + xm / (xa + M_MIN)) * 0.5 + 1.0
    a = (x1 / (xm + M_MIN)) * (x1 / (xm + M_MIN)) * a_ \
        + (z2 / (m_x + M_MIN)) * (x0 / (m_x + M_MIN))
    sa = 1.0 / (1.0 + np.exp(-a))
    sa_b = np.broadcast_to(sa[:, None, :, :], (B, C, H, W))
    return x_cg * sa_b + x_cg, ca, sa_b


if __name__ == "__main__":
    C = GATE_CHANNELS
    key = jax.random.PRNGKey(0)
    ks = jax.random.split(key, 6)

    params = {
        "mlp_w1": jax.random.normal(ks[1], (C,), jnp.float32) * 0.3,   # Linear(16,1) W
        "mlp_b1": 0.1,                                                 # Linear(16,1) b
        "mlp_w2": jax.random.normal(ks[2], (C,), jnp.float32) * 0.3,   # Linear(1,16) W
        "mlp_b2": jax.random.normal(ks[3], (C,), jnp.float32) * 0.1,   # Linear(1,16) b
        "conv1_w": jax.random.normal(ks[4], (C, 3, 3), jnp.float32) * 0.2,
        "bn_gamma": 1.2, "bn_beta": 0.05, "bn_mean": 0.0, "bn_var": 1.0,
        "conv2_w": 0.8,
    }

    # case 0: small batch (single grid step); case 1: batched steps + padding path
    for case, B in enumerate((2, 10)):
        H = W = 16
        x = jax.random.normal(jax.random.fold_in(ks[0], case),
                              (B, C, H, W), jnp.float32)
        x_out, ca, sa = jax.block_until_ready(
            scale_atten_block_softpool(x, params))
        ref_xout, ref_ca, ref_sa = reference_forward(np.asarray(x), params)
        np.testing.assert_allclose(np.asarray(x_out), ref_xout, rtol=1e-3, atol=1e-3)
        np.testing.assert_allclose(np.asarray(ca), ref_ca, rtol=1e-3, atol=1e-3)
        np.testing.assert_allclose(np.asarray(sa), ref_sa, rtol=1e-3, atol=1e-3)

    print("KERNEL_OK")
</pallas_src>

<mosaic_0001>
module attributes {stable_mosaic.version = 11 : i64} {
  func.func @_scale_atten_kernel(%arg0: i32, %arg1: memref<16x3xf32, #tpu.memory_space<vmem>>, %arg2: memref<16x16xf32, #tpu.memory_space<vmem>>, %arg3: memref<16x256xf32, #tpu.memory_space<vmem>>, %arg4: memref<3xf32, #tpu.memory_space<smem>>, %arg5: memref<2x16x256xf32, #tpu.memory_space<vmem>>, %arg6: memref<2x16x256xf32, #tpu.memory_space<vmem>>, %arg7: memref<2x16x1xf32, #tpu.memory_space<vmem>>, %arg8: memref<2x1x256xf32, #tpu.memory_space<vmem>>) attributes {dimension_semantics = [#tpu.dimension_semantics<parallel>], iteration_bounds = array<i64: 1>, scalar_prefetch = 0 : i64, scratch_operands = 0 : i64, tpu.core_type = #tpu.core_type<tc>, window_params = [{pipeline_mode = #tpu.pipeline_mode<synchronous>, transform_indices = @transform_0, window_bounds = array<i64: 16, 3>}, {pipeline_mode = #tpu.pipeline_mode<synchronous>, transform_indices = @transform_1, window_bounds = array<i64: 16, 16>}, {pipeline_mode = #tpu.pipeline_mode<synchronous>, transform_indices = @transform_2, window_bounds = array<i64: 16, 256>}, {transform_indices = @transform_3, window_bounds = array<i64: 3>}, {transform_indices = @transform_4, window_bounds = array<i64: 2, 16, 256>}, {transform_indices = @transform_5, window_bounds = array<i64: 2, 16, 256>}, {transform_indices = @transform_6, window_bounds = array<i64: 2, 16, 1>}, {transform_indices = @transform_7, window_bounds = array<i64: 2, 1, 256>}]} {
    %c0 = arith.constant 0 : index
    %c0_0 = arith.constant 0 : index
    %c0_1 = arith.constant 0 : index
    %0 = vector.load %arg5[%c0, %c0_0, %c0_1] : memref<2x16x256xf32, #tpu.memory_space<vmem>>, vector<2x16x256xf32>
    %c0_2 = arith.constant 0 : index
    %c0_3 = arith.constant 0 : index
    %1 = vector.load %arg1[%c0_2, %c0_3] : memref<16x3xf32, #tpu.memory_space<vmem>>, vector<16x1xf32>
    %2 = vector.shape_cast %1 : vector<16x1xf32> to vector<1x16x1xf32>
    %c0_4 = arith.constant 0 : index
    %c1 = arith.constant 1 : index
    %3 = vector.load %arg1[%c0_4, %c1] : memref<16x3xf32, #tpu.memory_space<vmem>>, vector<16x1xf32>
    %4 = vector.shape_cast %3 : vector<16x1xf32> to vector<1x16x1xf32>
    %c0_5 = arith.constant 0 : index
    %c2 = arith.constant 2 : index
    %5 = vector.load %arg1[%c0_5, %c2] : memref<16x3xf32, #tpu.memory_space<vmem>>, vector<16x1xf32>
    %6 = vector.shape_cast %5 : vector<16x1xf32> to vector<1x16x1xf32>
    %c0_6 = arith.constant 0 : index
    %7 = memref.load %arg4[%c0_6] : memref<3xf32, #tpu.memory_space<smem>>
    %cst = arith.constant dense<0xFF800000> : vector<2x16xf32>
    %8 = vector.multi_reduction <maximumf>, %0, %cst [2] : vector<2x16x256xf32> to vector<2x16xf32>
    %9 = vector.shape_cast %8 : vector<2x16xf32> to vector<2x16x1xf32>
    %cst_7 = arith.constant dense<0.000000e+00> : vector<2x16xf32>
    %10 = vector.multi_reduction <add>, %0, %cst_7 [2] : vector<2x16x256xf32> to vector<2x16xf32>
    %11 = vector.shape_cast %10 : vector<2x16xf32> to vector<2x16x1xf32>
    %cst_8 = arith.constant 2.560000e+02 : f32
    %12 = vector.broadcast %cst_8 : f32 to vector<2x16x1xf32>
    %13 = arith.divf %11, %12 : vector<2x16x1xf32>
    %14 = vector.broadcast %9 : vector<2x16x1xf32> to vector<2x16x256xf32>
    %15 = arith.subf %0, %14 : vector<2x16x256xf32>
    %16 = math.exp %15 : vector<2x16x256xf32>
    %17 = arith.mulf %16, %0 : vector<2x16x256xf32>
    %cst_9 = arith.constant dense<0.000000e+00> : vector<2x16xf32>
    %18 = vector.multi_reduction <add>, %17, %cst_9 [2] : vector<2x16x256xf32> to vector<2x16xf32>
    %19 = vector.shape_cast %18 : vector<2x16xf32> to vector<2x16x1xf32>
    %cst_10 = arith.constant dense<0.000000e+00> : vector<2x16xf32>
    %20 = vector.multi_reduction <add>, %16, %cst_10 [2] : vector<2x16x256xf32> to vector<2x16xf32>
    %21 = vector.shape_cast %20 : vector<2x16xf32> to vector<2x16x1xf32>
    %22 = arith.divf %19, %21 : vector<2x16x1xf32>
    %23 = vector.broadcast %2 : vector<1x16x1xf32> to vector<2x16x1xf32>
    %24 = arith.mulf %13, %23 : vector<2x16x1xf32>
    %cst_11 = arith.constant dense<0.000000e+00> : vector<2x1xf32>
    %25 = vector.multi_reduction <add>, %24, %cst_11 [1] : vector<2x16x1xf32> to vector<2x1xf32>
    %26 = vector.shape_cast %25 : vector<2x1xf32> to vector<2x1x1xf32>
    %27 = vector.broadcast %7 : f32 to vector<2x1x1xf32>
    %28 = arith.addf %26, %27 : vector<2x1x1xf32>
    %cst_12 = arith.constant 0.000000e+00 : f32
    %29 = vector.broadcast %cst_12 : f32 to vector<2x1x1xf32>
    %30 = arith.maximumf %28, %29 : vector<2x1x1xf32>
    %31 = vector.broadcast %2 : vector<1x16x1xf32> to vector<2x16x1xf32>
    %32 = arith.mulf %9, %31 : vector<2x16x1xf32>
    %cst_13 = arith.constant dense<0.000000e+00> : vector<2x1xf32>
    %33 = vector.multi_reduction <add>, %32, %cst_13 [1] : vector<2x16x1xf32> to vector<2x1xf32>
    %34 = vector.shape_cast %33 : vector<2x1xf32> to vector<2x1x1xf32>
    %35 = vector.broadcast %7 : f32 to vector<2x1x1xf32>
    %36 = arith.addf %34, %35 : vector<2x1x1xf32>
    %cst_14 = arith.constant 0.000000e+00 : f32
    %37 = vector.broadcast %cst_14 : f32 to vector<2x1x1xf32>
    %38 = arith.maximumf %36, %37 : vector<2x1x1xf32>
    %39 = arith.addf %30, %38 : vector<2x1x1xf32>
    %40 = vector.broadcast %2 : vector<1x16x1xf32> to vector<2x16x1xf32>
    %41 = arith.mulf %22, %40 : vector<2x16x1xf32>
    %cst_15 = arith.constant dense<0.000000e+00> : vector<2x1xf32>
    %42 = vector.multi_reduction <add>, %41, %cst_15 [1] : vector<2x16x1xf32> to vector<2x1xf32>
    %43 = vector.shape_cast %42 : vector<2x1xf32> to vector<2x1x1xf32>
    %44 = vector.broadcast %7 : f32 to vector<2x1x1xf32>
    %45 = arith.addf %43, %44 : vector<2x1x1xf32>
    %cst_16 = arith.constant 0.000000e+00 : f32
    %46 = vector.broadcast %cst_16 : f32 to vector<2x1x1xf32>
    %47 = arith.maximumf %45, %46 : vector<2x1x1xf32>
    %48 = arith.addf %39, %47 : vector<2x1x1xf32>
    %49 = vector.broadcast %48 : vector<2x1x1xf32> to vector<2x16x1xf32>
    %50 = vector.broadcast %4 : vector<1x16x1xf32> to vector<2x16x1xf32>
    %51 = arith.mulf %49, %50 : vector<2x16x1xf32>
    %52 = vector.broadcast %6 : vector<1x16x1xf32> to vector<2x16x1xf32>
    %53 = arith.addf %51, %52 : vector<2x16x1xf32>
    %54 = arith.negf %53 : vector<2x16x1xf32>
    %55 = math.exp %54 : vector<2x16x1xf32>
    %cst_17 = arith.constant 1.000000e+00 : f32
    %56 = vector.broadcast %cst_17 : f32 to vector<2x16x1xf32>
    %57 = arith.addf %56, %55 : vector<2x16x1xf32>
    %58 = arith.divf %56, %57 : vector<2x16x1xf32>
    %c0_18 = arith.constant 0 : index
    %c0_19 = arith.constant 0 : index
    %c0_20 = arith.constant 0 : index
    %59 = vector.load %arg7[%c0_18, %c0_19, %c0_20] : memref<2x16x1xf32, #tpu.memory_space<vmem>>, vector<2x16x1xf32>
    tpu.vector_store %arg7[%c0_18, %c0_19, %c0_20], %58 {strides = array<i32>} : memref<2x16x1xf32, #tpu.memory_space<vmem>>, vector<2x16x1xf32>,
    %60 = vector.broadcast %58 : vector<2x16x1xf32> to vector<2x16x256xf32>
    %61 = arith.mulf %0, %60 : vector<2x16x256xf32>
    %c1_21 = arith.constant 1 : index
    %62 = memref.load %arg4[%c1_21] : memref<3xf32, #tpu.memory_space<smem>>
    %c2_22 = arith.constant 2 : index
    %63 = memref.load %arg4[%c2_22] : memref<3xf32, #tpu.memory_space<smem>>
    %c0_23 = arith.constant 0 : index
    %c0_24 = arith.constant 0 : index
    %64 = vector.load %arg2[%c0_23, %c0_24] : memref<16x16xf32, #tpu.memory_space<vmem>>, vector<16x16xf32>
    %65 = vector.shape_cast %64 : vector<16x16xf32> to vector<1x16x16xf32>
    %66 = vector.shape_cast %65 : vector<1x16x16xf32> to vector<1x16x16xf32>
    %67 = vector.broadcast %66 : vector<1x16x16xf32> to vector<2x16x16xf32>
    "tpu.trace_start"() <{level = 10 : i32, message = "bkc,bcp->bkp"}> : () -> ()
    %cst_25 = arith.constant dense<0.000000e+00> : vector<2x16x256xf32>
    %68 = tpu.matmul %67, %61, %cst_25 {dimension_numbers = #tpu.dot_dimension_numbers<[2], [1], [1], [2], [0, 0, 0, 1, 1, 2], [0], [0]>} : vector<2x16x16xf32>, vector<2x16x256xf32>, vector<2x16x256xf32> -> vector<2x16x256xf32>
    "tpu.trace_stop"() : () -> ()
    %69 = vector.extract_strided_slice %68 {offsets = [0, 4, 0], sizes = [2, 1, 256], strides = [1, 1, 1]} : vector<2x16x256xf32> to vector<2x1x256xf32>
    %70 = vector.extract_strided_slice %68 {offsets = [0, 0, 0], sizes = [2, 1, 256], strides = [1, 1, 1]} : vector<2x16x256xf32> to vector<2x1x256xf32>
    %c0_26 = arith.constant 0 : index
    %c0_27 = arith.constant 0 : index
    %71 = vector.load %arg3[%c0_26, %c0_27] : memref<16x256xf32, #tpu.memory_space<vmem>>, vector<1x256xf32>
    %72 = vector.shape_cast %71 : vector<1x256xf32> to vector<1x1x256xf32>
    %73 = vector.broadcast %72 : vector<1x1x256xf32> to vector<2x1x256xf32>
    %74 = arith.mulf %70, %73 : vector<2x1x256xf32>
    %c17_i32 = arith.constant 17 : i32
    %75 = tpu.dynamic_rotate %74 by %c17_i32 dim 2 : vector<2x1x256xf32>, i32 -> vector<2x1x256xf32>
    %76 = arith.addf %69, %75 : vector<2x1x256xf32>
    %77 = vector.extract_strided_slice %68 {offsets = [0, 1, 0], sizes = [2, 1, 256], strides = [1, 1, 1]} : vector<2x16x256xf32> to vector<2x1x256xf32>
    %c1_28 = arith.constant 1 : index
    %c0_29 = arith.constant 0 : index
    %78 = vector.load %arg3[%c1_28, %c0_29] : memref<16x256xf32, #tpu.memory_space<vmem>>, vector<1x256xf32>
    %79 = vector.shape_cast %78 : vector<1x256xf32> to vector<1x1x256xf32>
    %80 = vector.broadcast %79 : vector<1x1x256xf32> to vector<2x1x256xf32>
    %81 = arith.mulf %77, %80 : vector<2x1x256xf32>
    %c16_i32 = arith.constant 16 : i32
    %82 = tpu.dynamic_rotate %81 by %c16_i32 dim 2 : vector<2x1x256xf32>, i32 -> vector<2x1x256xf32>
    %83 = arith.addf %76, %82 : vector<2x1x256xf32>
    %84 = vector.extract_strided_slice %68 {offsets = [0, 2, 0], sizes = [2, 1, 256], strides = [1, 1, 1]} : vector<2x16x256xf32> to vector<2x1x256xf32>
    %c2_30 = arith.constant 2 : index
    %c0_31 = arith.constant 0 : index
    %85 = vector.load %arg3[%c2_30, %c0_31] : memref<16x256xf32, #tpu.memory_space<vmem>>, vector<1x256xf32>
    %86 = vector.shape_cast %85 : vector<1x256xf32> to vector<1x1x256xf32>
    %87 = vector.broadcast %86 : vector<1x1x256xf32> to vector<2x1x256xf32>
    %88 = arith.mulf %84, %87 : vector<2x1x256xf32>
    %c15_i32 = arith.constant 15 : i32
    %89 = tpu.dynamic_rotate %88 by %c15_i32 dim 2 : vector<2x1x256xf32>, i32 -> vector<2x1x256xf32>
    %90 = arith.addf %83, %89 : vector<2x1x256xf32>
    %91 = vector.extract_strided_slice %68 {offsets = [0, 3, 0], sizes = [2, 1, 256], strides = [1, 1, 1]} : vector<2x16x256xf32> to vector<2x1x256xf32>
    %c3 = arith.constant 3 : index
    %c0_32 = arith.constant 0 : index
    %92 = vector.load %arg3[%c3, %c0_32] : memref<16x256xf32, #tpu.memory_space<vmem>>, vector<1x256xf32>
    %93 = vector.shape_cast %92 : vector<1x256xf32> to vector<1x1x256xf32>
    %94 = vector.broadcast %93 : vector<1x1x256xf32> to vector<2x1x256xf32>
    %95 = arith.mulf %91, %94 : vector<2x1x256xf32>
    %c1_i32 = arith.constant 1 : i32
    %96 = tpu.dynamic_rotate %95 by %c1_i32 dim 2 : vector<2x1x256xf32>, i32 -> vector<2x1x256xf32>
    %97 = arith.addf %90, %96 : vector<2x1x256xf32>
    %98 = vector.extract_strided_slice %68 {offsets = [0, 5, 0], sizes = [2, 1, 256], strides = [1, 1, 1]} : vector<2x16x256xf32> to vector<2x1x256xf32>
    %c5 = arith.constant 5 : index
    %c0_33 = arith.constant 0 : index
    %99 = vector.load %arg3[%c5, %c0_33] : memref<16x256xf32, #tpu.memory_space<vmem>>, vector<1x256xf32>
    %100 = vector.shape_cast %99 : vector<1x256xf32> to vector<1x1x256xf32>
    %101 = vector.broadcast %100 : vector<1x1x256xf32> to vector<2x1x256xf32>
    %102 = arith.mulf %98, %101 : vector<2x1x256xf32>
    %c255_i32 = arith.constant 255 : i32
    %103 = tpu.dynamic_rotate %102 by %c255_i32 dim 2 : vector<2x1x256xf32>, i32 -> vector<2x1x256xf32>
    %104 = arith.addf %97, %103 : vector<2x1x256xf32>
    %105 = vector.extract_strided_slice %68 {offsets = [0, 6, 0], sizes = [2, 1, 256], strides = [1, 1, 1]} : vector<2x16x256xf32> to vector<2x1x256xf32>
    %c6 = arith.constant 6 : index
    %c0_34 = arith.constant 0 : index
    %106 = vector.load %arg3[%c6, %c0_34] : memref<16x256xf32, #tpu.memory_space<vmem>>, vector<1x256xf32>
    %107 = vector.shape_cast %106 : vector<1x256xf32> to vector<1x1x256xf32>
    %108 = vector.broadcast %107 : vector<1x1x256xf32> to vector<2x1x256xf32>
    %109 = arith.mulf %105, %108 : vector<2x1x256xf32>
    %c241_i32 = arith.constant 241 : i32
    %110 = tpu.dynamic_rotate %109 by %c241_i32 dim 2 : vector<2x1x256xf32>, i32 -> vector<2x1x256xf32>
    %111 = arith.addf %104, %110 : vector<2x1x256xf32>
    %112 = vector.extract_strided_slice %68 {offsets = [0, 7, 0], sizes = [2, 1, 256], strides = [1, 1, 1]} : vector<2x16x256xf32> to vector<2x1x256xf32>
    %c7 = arith.constant 7 : index
    %c0_35 = arith.constant 0 : index
    %113 = vector.load %arg3[%c7, %c0_35] : memref<16x256xf32, #tpu.memory_space<vmem>>, vector<1x256xf32>
    %114 = vector.shape_cast %113 : vector<1x256xf32> to vector<1x1x256xf32>
    %115 = vector.broadcast %114 : vector<1x1x256xf32> to vector<2x1x256xf32>
    %116 = arith.mulf %112, %115 : vector<2x1x256xf32>
    %c240_i32 = arith.constant 240 : i32
    %117 = tpu.dynamic_rotate %116 by %c240_i32 dim 2 : vector<2x1x256xf32>, i32 -> vector<2x1x256xf32>
    %118 = arith.addf %111, %117 : vector<2x1x256xf32>
    %119 = vector.extract_strided_slice %68 {offsets = [0, 8, 0], sizes = [2, 1, 256], strides = [1, 1, 1]} : vector<2x16x256xf32> to vector<2x1x256xf32>
    %c8 = arith.constant 8 : index
    %c0_36 = arith.constant 0 : index
    %120 = vector.load %arg3[%c8, %c0_36] : memref<16x256xf32, #tpu.memory_space<vmem>>, vector<1x256xf32>
    %121 = vector.shape_cast %120 : vector<1x256xf32> to vector<1x1x256xf32>
    %122 = vector.broadcast %121 : vector<1x1x256xf32> to vector<2x1x256xf32>
    %123 = arith.mulf %119, %122 : vector<2x1x256xf32>
    %c239_i32 = arith.constant 239 : i32
    %124 = tpu.dynamic_rotate %123 by %c239_i32 dim 2 : vector<2x1x256xf32>, i32 -> vector<2x1x256xf32>
    %125 = arith.addf %118, %124 : vector<2x1x256xf32>
    %126 = vector.broadcast %62 : f32 to vector<2x1x256xf32>
    %127 = arith.addf %125, %126 : vector<2x1x256xf32>
    %cst_37 = arith.constant 0.000000e+00 : f32
    %128 = vector.broadcast %cst_37 : f32 to vector<2x1x256xf32>
    %129 = arith.maximumf %127, %128 : vector<2x1x256xf32>
    %130 = vector.broadcast %63 : f32 to vector<2x1x256xf32>
    %131 = arith.mulf %129, %130 : vector<2x1x256xf32>
    %cst_38 = arith.constant 0.000000e+00 : f32
    %132 = vector.broadcast %cst_38 : f32 to vector<2x1x256xf32>
    %133 = arith.maximumf %131, %132 : vector<2x1x256xf32>
    %cst_39 = arith.constant dense<0xFF800000> : vector<2x1xf32>
    %134 = vector.multi_reduction <maximumf>, %133, %cst_39 [2] : vector<2x1x256xf32> to vector<2x1xf32>
    %135 = vector.shape_cast %134 : vector<2x1xf32> to vector<2x1x1xf32>
    %cst_40 = arith.constant dense<0.000000e+00> : vector<2x1xf32>
    %136 = vector.multi_reduction <add>, %133, %cst_40 [2] : vector<2x1x256xf32> to vector<2x1xf32>
    %137 = vector.shape_cast %136 : vector<2x1xf32> to vector<2x1x1xf32>
    %cst_41 = arith.constant 2.560000e+02 : f32
    %138 = vector.broadcast %cst_41 : f32 to vector<2x1x1xf32>
    %139 = arith.divf %137, %138 : vector<2x1x1xf32>
    %140 = arith.addf %135, %139 : vector<2x1x1xf32>
    %141 = arith.subf %135, %139 : vector<2x1x1xf32>
    %cst_42 = arith.constant 1.000000e-07 : f32
    %142 = vector.broadcast %cst_42 : f32 to vector<2x1x1xf32>
    %143 = arith.addf %141, %142 : vector<2x1x1xf32>
    %144 = arith.divf %140, %143 : vector<2x1x1xf32>
    %cst_43 = arith.constant 1.000000e-07 : f32
    %145 = vector.broadcast %cst_43 : f32 to vector<2x1x1xf32>
    %146 = arith.addf %139, %145 : vector<2x1x1xf32>
    %147 = arith.divf %135, %146 : vector<2x1x1xf32>
    %148 = arith.addf %144, %147 : vector<2x1x1xf32>
    %cst_44 = arith.constant 5.000000e-01 : f32
    %149 = vector.broadcast %cst_44 : f32 to vector<2x1x1xf32>
    %150 = arith.mulf %148, %149 : vector<2x1x1xf32>
    %cst_45 = arith.constant 1.000000e+00 : f32
    %151 = vector.broadcast %cst_45 : f32 to vector<2x1x1xf32>
    %152 = arith.addf %150, %151 : vector<2x1x1xf32>
    %cst_46 = arith.constant 1.000000e-07 : f32
    %153 = vector.broadcast %cst_46 : f32 to vector<2x1x1xf32>
    %154 = arith.addf %135, %153 : vector<2x1x1xf32>
    %155 = tpu.reciprocal %154 {approx = true} : vector<2x1x1xf32> -> vector<2x1x1xf32>
    %156 = vector.broadcast %155 : vector<2x1x1xf32> to vector<2x1x256xf32>
    %157 = arith.mulf %133, %156 : vector<2x1x256xf32>
    %158 = arith.mulf %157, %157 : vector<2x1x256xf32>
    %cst_47 = arith.constant 1.000000e+00 : f32
    %159 = vector.broadcast %cst_47 : f32 to vector<2x1x1xf32>
    %160 = arith.addf %152, %159 : vector<2x1x1xf32>
    %161 = vector.broadcast %160 : vector<2x1x1xf32> to vector<2x1x256xf32>
    %162 = arith.mulf %158, %161 : vector<2x1x256xf32>
    %163 = arith.negf %162 : vector<2x1x256xf32>
    %164 = math.exp %163 : vector<2x1x256xf32>
    %cst_48 = arith.constant 1.000000e+00 : f32
    %165 = vector.broadcast %cst_48 : f32 to vector<2x1x256xf32>
    %166 = arith.addf %165, %164 : vector<2x1x256xf32>
    %167 = arith.divf %165, %166 : vector<2x1x256xf32>
    %c0_49 = arith.constant 0 : index
    %c0_50 = arith.constant 0 : index
    %c0_51 = arith.constant 0 : index
    %168 = vector.load %arg8[%c0_49, %c0_50, %c0_51] : memref<2x1x256xf32, #tpu.memory_space<vmem>>, vector<2x1x256xf32>
    tpu.vector_store %arg8[%c0_49, %c0_50, %c0_51], %167 {strides = array<i32>} : memref<2x1x256xf32, #tpu.memory_space<vmem>>, vector<2x1x256xf32>,
    %cst_52 = arith.constant 1.000000e+00 : f32
    %169 = vector.broadcast %cst_52 : f32 to vector<2x1x256xf32>
    %170 = arith.addf %167, %169 : vector<2x1x256xf32>
    %171 = vector.broadcast %170 : vector<2x1x256xf32> to vector<2x16x256xf32>
    %172 = arith.mulf %61, %171 : vector<2x16x256xf32>
    %c0_53 = arith.constant 0 : index
    %c0_54 = arith.constant 0 : index
    %c0_55 = arith.constant 0 : index
    %173 = vector.load %arg6[%c0_53, %c0_54, %c0_55] : memref<2x16x256xf32, #tpu.memory_space<vmem>>, vector<2x16x256xf32>
    tpu.vector_store %arg6[%c0_53, %c0_54, %c0_55], %172 {strides = array<i32>} : memref<2x16x256xf32, #tpu.memory_space<vmem>>, vector<2x16x256xf32>,
    return
  }
  func.func @transform_0(%arg0: i32) -> (i32, i32) {
    %c0_i32 = arith.constant 0 : i32
    %c0_i32_0 = arith.constant 0 : i32
    %c0_i32_1 = arith.constant 0 : i32
    return %c0_i32, %c0_i32_0 : i32, i32
  }
  func.func @transform_1(%arg0: i32) -> (i32, i32) {
    %c0_i32 = arith.constant 0 : i32
    %c0_i32_0 = arith.constant 0 : i32
    %c0_i32_1 = arith.constant 0 : i32
    return %c0_i32, %c0_i32_0 : i32, i32
  }
  func.func @transform_2(%arg0: i32) -> (i32, i32) {
    %c0_i32 = arith.constant 0 : i32
    %c0_i32_0 = arith.constant 0 : i32
    %c0_i32_1 = arith.constant 0 : i32
    return %c0_i32, %c0_i32_0 : i32, i32
  }
  func.func @transform_3(%arg0: i32) -> i32 {
    %c0_i32 = arith.constant 0 : i32
    %c0_i32_0 = arith.constant 0 : i32
    return %c0_i32 : i32
  }
  func.func @transform_4(%arg0: i32) -> (i32, i32, i32) {
    %c0_i32 = arith.constant 0 : i32
    %c0_i32_0 = arith.constant 0 : i32
    %c0_i32_1 = arith.constant 0 : i32
    return %arg0, %c0_i32, %c0_i32_0 : i32, i32, i32
  }
  func.func @transform_5(%arg0: i32) -> (i32, i32, i32) {
    %c0_i32 = arith.constant 0 : i32
    %c0_i32_0 = arith.constant 0 : i32
    %c0_i32_1 = arith.constant 0 : i32
    return %arg0, %c0_i32, %c0_i32_0 : i32, i32, i32
  }
  func.func @transform_6(%arg0: i32) -> (i32, i32, i32) {
    %c0_i32 = arith.constant 0 : i32
    %c0_i32_0 = arith.constant 0 : i32
    %c0_i32_1 = arith.constant 0 : i32
    return %arg0, %c0_i32, %c0_i32_0 : i32, i32, i32
  }
  func.func @transform_7(%arg0: i32) -> (i32, i32, i32) {
    %c0_i32 = arith.constant 0 : i32
    %c0_i32_0 = arith.constant 0 : i32
    %c0_i32_1 = arith.constant 0 : i32
    return %arg0, %c0_i32, %c0_i32_0 : i32, i32, i32
  }
}

</mosaic_0001>

<bundles_post_ra>
// kernel: tpu_custom_call.1
= control target key start
LH: loop header
LB: loop body
LE: loop exit
PB: predicated region body
PF: predicated region fallthrough
CT: control target
= control target key end

     0   :  { %13 = vsyncpa [#allocation3], 0  ;;  %s1889_s0 = inlined_call_operand.vmem [shape: f32[16,3], index: 0, kind: input, shape index: {}]   ;;  %s1890_s1 = inlined_call_operand.vmem [shape: f32[16,16], index: 1, kind: input, shape index: {}]   ;;  %s1891_s2 = inlined_call_operand.hbm [shape: f32[16,256], index: 2, kind: input, shape index: {}]   ;;  %s1892_s3 = inlined_call_operand.vmem [shape: f32[3], index: 3, kind: input, shape index: {}]   ;;  %s1893_s4 = inlined_call_operand.hbm [shape: f32[2,16,256], index: 4, kind: input, shape index: {}]   ;;  %s1894_s5 = inlined_call_operand.hbm [shape: f32[2,16,256], index: 5, kind: output, shape index: {0}]   ;;  %s1895_s6 = inlined_call_operand.vmem [shape: f32[2,16,1], index: 6, kind: output, shape index: {1}]   ;;  %s1896_s7 = inlined_call_operand.hbm [shape: f32[2,1,256], index: 7, kind: output, shape index: {2}]  }
   0x1   :  { %14 = vsyncpa [#allocation5], 0 }
   0x2   :  { %15 = vsyncpa [#allocation8], 0 }
   0x3   :  { %16 = vsyncpa [#allocation4], 0 }
   0x4   :  { %17 = vsyncpa [#allocation11], 0  ;;  %s1382_s24 = smov [#allocation2]   ;;  %s40_s28 = sshll.u32 %s1892_s3, 4  ;;  %s41_s28 = int_to_ptr.vmem [resolvable:$true] %s40_s28 }
   0x5   :  { %s27_s25 = sshll.u32 %s1382_s24, 4  ;;  %s1272_s8 = scalar_lea.hbm %s1891_s2, 512  ;;  %s28_s25 = int_to_ptr.vmem [resolvable:$true] %s27_s25 }
   0x6   :  { %p1273_p0 = scmp.ne.s32.totalorder %s1891_s2, %s1272_s8  ;;  %p1276_p1 = scmp.lt.u32.totalorder %s1272_s8, %s1891_s2 }
   0x8   :  { %p1278_p2 = pnand %p1276_p1, %p1273_p0 }
   0xa   :  { %1281 = shalt.err (!%p1278_p2)
}
   0xb   :  { %s1282_s13 = scalar_lea.vmem %s28_s25, 512  ;;  %p1287_p4 = scmp.lt.s32.totalorder %s28_s25, %s28_s25 }
   0xc   :  { %p1283_p3 = scmp.ne.s32.totalorder %s28_s25, %s1282_s13  ;;  %p1288_p5 = scmp.lt.s32.totalorder %s1282_s13, %s1282_s13 }
   0xe   :  { %p1289_p6 = por %p1288_p5, %p1287_p4 }
  0x10   :  { %p1290_p7 = pnand %p1289_p6, %p1283_p3 }
  0x12   :  { %1293 = shalt.err (!%p1290_p7)
}
  0x13   :  { %s1383_s3 = smov 256   ;;  %s1384_s14 = smov 16  }
  0x14   :  { %33 = dma.hbm_to_vmem [thread:$0]  %s1891_s2, 512, %s28_s25, [#allocation3], %s1383_s3, %s1383_s3, %s1384_s14  }
  0x15   :  { %s1294_s17 = scalar_lea.vmem %s41_s28, 16  ;;  %p1299_p9 = scmp.lt.s32.totalorder %s41_s28, %s41_s28 }
  0x16   :  { %p1295_p8 = scmp.ne.s32.totalorder %s41_s28, %s1294_s17  ;;  %p1300_p10 = scmp.lt.s32.totalorder %s1294_s17, %s1294_s17 }
  0x18   :  { %p1301_p11 = por %p1300_p10, %p1299_p9 }
  0x1a   :  { %p1302_p12 = pnand %p1301_p11, %p1295_p8 }
  0x1c   :  { %1305 = shalt.err (!%p1302_p12)
}
  0x1d   :  { %s1385_s18 = smov [#allocation6]   ;;  %s1386_s19 = smov [#allocation7]  }
  0x1e   :  { %43 = dma.vmem_to_smem %s41_s28, 16, %s1385_s18, [#allocation5]  }
  0x1f   :  { %s49_s20 = sshll.u32 %s1386_s19, 4  ;;  %s1306_s23 = scalar_lea.hbm %s1893_s4, 1024  ;;  %s50_s20 = int_to_ptr.vmem [resolvable:$true] %s49_s20 }
  0x20   :  { %p1307_p13 = scmp.ne.s32.totalorder %s1893_s4, %s1306_s23  ;;  %p1310_p0 = scmp.lt.u32.totalorder %s1306_s23, %s1893_s4 }
  0x22   :  { %p1312_p1 = pnand %p1310_p0, %p1307_p13 }
  0x24   :  { %1315 = shalt.err (!%p1312_p1)
}
  0x25   :  { %s1316_s27 = scalar_lea.vmem %s50_s20, 1024  ;;  %p1321_p3 = scmp.lt.s32.totalorder %s50_s20, %s50_s20 }
  0x26   :  { %p1317_p2 = scmp.ne.s32.totalorder %s50_s20, %s1316_s27  ;;  %p1322_p4 = scmp.lt.s32.totalorder %s1316_s27, %s1316_s27 }
  0x28   :  { %p1323_p5 = por %p1322_p4, %p1321_p3 }
  0x2a   :  { %p1324_p6 = pnand %p1323_p5, %p1317_p2 }
  0x2c   :  { %1327 = shalt.err (!%p1324_p6)
}
  0x2d   :  { %55 = dma.hbm_to_vmem [thread:$0]  %s1893_s4, 1024, %s50_s20, [#allocation8], %s1383_s3, %s1383_s3, %s1384_s14  }
  0x2e   :  { %1372 = dma.done.wait [#allocation3], 512  }
  0x2f   :  { %1373 = vsyncadd [#allocation3], 4294966784 }
  0x30   :  { %1374 = dma.done.wait [#allocation5], 16  }
  0x31   :  { %1375 = vsyncadd [#allocation5], 4294967280 }
  0x32   :  { %1376 = dma.done.wait [#allocation8], 1024  }
  0x33   :  { %1377 = vsyncadd [#allocation8], 4294966272 }
  0x34   :  { %65 = sfence }
  0x35   :  { %v1475_v0 = vld [vmem:[#allocation7 + $0x20] sm:$0xff]  ;;  %v1477_v1 = vld [vmem:[#allocation7 + $0x28] sm:$0xff]  ;;  %v1485_v5 = vld [vmem:[#allocation7 + $0x30] sm:$0xff]  ;;  %vm174_vm0 = vcmask 7168   ;;  %s1388_s10 = smov 126   ;;  %s76_s11 = sld [smem:[#allocation6]] }
  0x36   :  { %v1479_v2 = vld [vmem:[#allocation7] sm:$0xff]  ;;  %v83_v3 = vmax.f32 %v1475_v0, %v1477_v1  ;;  %v1483_v4 = vld [vmem:[#allocation7 + $0x8] sm:$0xff]  ;;  %v1487_v6 = vld [vmem:[#allocation7 + $0x38] sm:$0xff]  ;;  %v95_v56 = vadd.f32 %v1477_v1, %v1475_v0  ;;  %vm336_vm1 = vcmask 130048   ;;  %s1392_s24 = smov 15   ;;  %s1393_s26 = smov 1  }
  0x37   :  { %v77_v7 = vmax.f32 %v1479_v2, %v1483_v4  ;;  %v1491_v8 = vld [vmem:[#allocation7 + $0x10] sm:$0xff]  ;;  %v1493_v9 = vld [vmem:[#allocation7 + $0x18] sm:$0xff]  ;;  %v86_v10 = vmax.f32 %v1485_v5, %v1487_v6  ;;  %v89_v13 = vadd.f32 %v1483_v4, %v1479_v2  ;;  %v1506_v14 = vld [vmem:[%s1889_s0] sm:$0xff]  ;;  %v98_v57 = vadd.f32 %v1487_v6, %v1485_v5  ;;  %s1394_s2 = smov 113   ;;  %s1395_s25 = smov 112  }
  0x38   :  { %84 = vmax.xlane.f32.xlu1 %v83_v3  ;;  %v80_v11 = vmax.f32 %v1491_v8, %v1493_v9  ;;  %v92_v12 = vadd.f32 %v1493_v9, %v1491_v8  ;;  %v1516_v22 = vld [vmem:[%s1889_s0 + $0x8] sm:$0xff]  ;;  %s1387_s0 = smov 127   ;;  %s1396_s27 = smov 111   ;;  %vm956_vm10 = vcmask 1044484  }
  0x39   :  { %78 = vmax.xlane.f32.xlu0 %v77_v7  ;;  %s1776_s28 = sld [smem:[#allocation6 + $0x1]]  ;;  %s1165_s29 = sld [smem:[#allocation6 + $0x2]] }
  0x3a   :  { %s1398_s4 = smov [#allocation9]   ;;  %s1399_s8 = smov [#allocation10]  }
  0x3b   :  { %s1126_s30 = sshll.u32 %s1398_s4, 4  ;;  %s1140_s9 = sshll.u32 %s1399_s8, 4  ;;  %s1127_s30 = int_to_ptr.vmem [resolvable:$true] %s1126_s30  ;;  %s1853_s9 = int_to_ptr.vmem [resolvable:$true] %s1140_s9 }
  0x3c   :  { %87 = vmax.xlane.f32.xlu1 %v86_v10  ;;  %p1333_p8 = scmp.lt.s32.totalorder %s1127_s30, %s1127_s30 }
  0x3d   :  { %81 = vmax.xlane.f32.xlu0 %v80_v11 }
  0x40   :  { %93 = vadd.xlane.f32.xlu1 %v92_v12 }
  0x41   :  { %90 = vadd.xlane.f32.xlu0 %v89_v13 }
  0xc5   :  { %v85_v15 = vpop.xlane.xlu1 %84 }
  0xc6   :  { %v110_v16 = vsub.f32 %v1475_v0, %v85_v15  ;;  %v111_v17 = vsub.f32 %v1477_v1, %v85_v15  ;;  %v200_v18 = vmul.f32 %v85_v15, %v1506_v14  ;;  %v79_v19 = vpop.xlane.xlu0 %78 }
  0xc7   :  { %v106_v20 = vsub.f32 %v1479_v2, %v79_v19  ;;  %v107_v21 = vsub.f32 %v1483_v4, %v79_v19  ;;  %v198_v29 = vmul.f32 %v79_v19, %v1506_v14 }
  0xc8   :  { %v122_v23 = vmul.f32 1.442695, %v110_v16  ;;  %v124_v24 = vmul.f32 1.442695, %v111_v17  ;;  %v211_v28 = vsel %vm174_vm0, %v200_v18, 0.0  ;;  %v1389_v17 = vmov 0  }
  0xc9   :  { %v114_v25 = vmul.f32 1.442695, %v106_v20  ;;  %v116_v26 = vmul.f32 1.442695, %v107_v21  ;;  %v88_v27 = vpop.xlane.xlu1 %87  ;;  %v202_v41 = vsel %vm174_vm0, %v198_v29, 0.0  ;;  %1203 = vset.pattern.permute.xlu1 %v1389_v17  ;;  %1202 = vset.pattern.permute.xlu0 %v1389_v17 }
  0xca   :  { %1204 = vpow2.f32 %v122_v23  ;;  %v201_v30 = vmul.f32 %v88_v27, %v1516_v22  ;;  %v82_v31 = vpop.xlane.xlu0 %81  ;;  %v112_v35 = vsub.f32 %v1485_v5, %v88_v27  ;;  %v113_v36 = vsub.f32 %v1487_v6, %v88_v27 }
  0xcb   :  { %1206 = vpow2.f32 %v124_v24  ;;  %v108_v32 = vsub.f32 %v1491_v8, %v82_v31  ;;  %v109_v33 = vsub.f32 %v1493_v9, %v82_v31  ;;  %v199_v34 = vmul.f32 %v82_v31, %v1516_v22 }
  0xcc   :  { %1208 = vpow2.f32 %v114_v25  ;;  %v212_v37 = vsel %vm174_vm0, %v201_v30, 0.0  ;;  %v126_v44 = vmul.f32 1.442695, %v112_v35  ;;  %v128_v45 = vmul.f32 1.442695, %v113_v36 }
  0xcd   :  { %1210 = vpow2.f32 %v116_v26  ;;  %v1527_v38 = vadd.f32 %v212_v37, %v211_v28  ;;  %v118_v39 = vmul.f32 1.442695, %v108_v32  ;;  %v120_v40 = vmul.f32 1.442695, %v109_v33  ;;  %v94_v18 = vpop.xlane.xlu1 %93 }
  0xce   :  { %v203_v42 = vsel %vm174_vm0, %v199_v34, 0.0  ;;  %v91_v19 = vpop.xlane.xlu0 %90  ;;  %v103_v20 = vmul.f32 0.00390625, %v94_v18 }
  0xcf   :  { %v1531_v43 = vadd.f32 %v203_v42, %v202_v41  ;;  %1212 = vpow2.f32 %v118_v39  ;;  %v102_v21 = vmul.f32 0.00390625, %v91_v19 }
  0xd0   :  { %1214 = vpow2.f32 %v120_v40  ;;  %v171_v23 = vmul.f32 %v103_v20, %v1516_v22 }
  0xd1   :  { %1216 = vpow2.f32 %v126_v44  ;;  %v170_v24 = vmul.f32 %v102_v21, %v1506_v14  ;;  %v205_v32 = vrot.slane %v1531_v43, 4 }
  0xd2   :  { %1218 = vpow2.f32 %v128_v45  ;;  %v176_v25 = vsel %vm174_vm0, %v171_v23, 0.0 }
  0xd3   :  { %v175_v26 = vsel %vm174_vm0, %v170_v24, 0.0  ;;  %v206_v42 = vadd.f32 %v205_v32, %v1531_v43 }
  0xd4   :  { %v1205_v46 = vpop.eup %1204  ;;  %v177_v28 = vadd.f32 %v176_v25, %v175_v26 }
  0xd5   :  { %v1207_v47 = vpop.eup %1206  ;;  %v134_v62 = vmul.f32 %v1205_v46, %v1475_v0 }
  0xd6   :  { %v1209_v48 = vpop.eup %1208  ;;  %v156_v52 = vadd.f32 %v1207_v47, %v1205_v46  ;;  %v135_v3 = vmul.f32 %v1207_v47, %v1477_v1  ;;  %v178_v31 = vrot.slane %v177_v28, 4 }
  0xd7   :  { %v1211_v49 = vpop.eup %1210  ;;  %v130_v59 = vmul.f32 %v1209_v48, %v1479_v2 }
  0xd8   :  { %v150_v50 = vadd.f32 %v1211_v49, %v1209_v48  ;;  %v131_v60 = vmul.f32 %v1211_v49, %v1483_v4  ;;  %v144_v11 = vadd.f32 %v135_v3, %v134_v62  ;;  %v179_v37 = vadd.f32 %v178_v31, %v177_v28 }
  0xd9   :  { %v1213_v51 = vpop.eup %1212 }
  0xda   :  { %151 = vadd.xlane.f32.xlu0 %v150_v50  ;;  %v1215_v53 = vpop.eup %1214  ;;  %v138_v63 = vadd.f32 %v131_v60, %v130_v59  ;;  %v132_v7 = vmul.f32 %v1213_v51, %v1491_v8  ;;  %v180_v49 = vrot.slane %v179_v37, 2 }
  0xdb   :  { %v153_v54 = vadd.f32 %v1215_v53, %v1213_v51  ;;  %v1217_v55 = vpop.eup %1216  ;;  %v133_v10 = vmul.f32 %v1215_v53, %v1493_v9  ;;  %v207_v53 = vrot.slane %v206_v42, 2 }
  0xdc   :  { %v1219_v58 = vpop.eup %1218  ;;  %v136_v13 = vmul.f32 %v1217_v55, %v1485_v5  ;;  %v181_v59 = vadd.f32 %v180_v49, %v179_v37 }
  0xdd   :  { %154 = vadd.xlane.f32.xlu1 %v153_v54  ;;  %v159_v61 = vadd.f32 %v1219_v58, %v1217_v55  ;;  %v141_v12 = vadd.f32 %v133_v10, %v132_v7  ;;  %v137_v15 = vmul.f32 %v1219_v58, %v1487_v6 }
  0xde   :  { %157 = vadd.xlane.f32.xlu0 %v156_v52  ;;  %v214_v52 = vrot.slane %v1527_v38, 4 }
  0xdf   :  { %v147_v16 = vadd.f32 %v137_v15, %v136_v13 }
  0xe1   :  { %99 = vadd.xlane.f32.xlu1 %v98_v57 }
  0xe2   :  { %96 = vadd.xlane.f32.xlu0 %v95_v56 }
  0xe5   :  { %160 = vadd.xlane.f32.xlu1 %v159_v61  ;;  %v215_v61 = vadd.f32 %v214_v52, %v1527_v38 }
  0xe6   :  { %139 = vadd.xlane.f32.xlu0 %v138_v63  ;;  %v208_v63 = vadd.f32 %v207_v53, %v206_v42 }
  0xe8   :  { %v209_v38 = vrot.slane %v208_v63, 1 }
  0xe9   :  { %142 = vadd.xlane.f32.xlu1 %v141_v12  ;;  %v182_v12 = vrot.slane %v181_v59, 1 }
  0xea   :  { %145 = vadd.xlane.f32.xlu0 %v144_v11 }
  0xeb   :  { %v183_v25 = vadd.f32 %v182_v12, %v181_v59 }
  0xed   :  { %148 = vadd.xlane.f32.xlu1 %v147_v16  ;;  %v216_v16 = vrot.slane %v215_v61, 2 }
  0xef   :  { %v217_v26 = vadd.f32 %v216_v16, %v215_v61 }
  0xf1   :  { %v218_v37 = vrot.slane %v217_v26, 1 }
  0xfe   :  { %258 = vrot.lane.b32.xlu1 %v1516_v22, %s1387_s0 }
 0x100   :  { %256 = vrot.lane.b32.xlu0 %v1506_v14, %s1387_s0 }
 0x102   :  { %266 = vrot.lane.b32.xlu1 %v1506_v14, %s1388_s10 }
 0x106   :  { %268 = vrot.lane.b32.xlu1 %v1516_v22, %s1388_s10 }
 0x167   :  { %v152_v27 = vpop.xlane.xlu0 %151 }
 0x168   :  { %1220 = vrcp.f32 %v152_v27 }
 0x16a   :  { %v155_v29 = vpop.xlane.xlu1 %154 }
 0x16b   :  { %v158_v30 = vpop.xlane.xlu0 %157  ;;  %1222 = vrcp.f32 %v155_v29 }
 0x16c   :  { %1224 = vrcp.f32 %v158_v30  ;;  %v210_v30 = vadd.f32 %v209_v38, %v208_v63 }
 0x16e   :  { %v100_v33 = vpop.xlane.xlu1 %99 }
 0x16f   :  { %v97_v34 = vpop.xlane.xlu0 %96  ;;  %v105_v35 = vmul.f32 0.00390625, %v100_v33  ;;  %v193_v33 = vstv %s76_s11 }
 0x170   :  { %v104_v36 = vmul.f32 0.00390625, %v97_v34 }
 0x171   :  { %v173_v40 = vmul.f32 %v105_v35, %v1516_v22 }
 0x172   :  { %v1221_v39 = vpop.eup %1220  ;;  %v172_v41 = vmul.f32 %v104_v36, %v1506_v14  ;;  %v161_v44 = vpop.xlane.xlu1 %160 }
 0x173   :  { %v140_v45 = vpop.xlane.xlu0 %139  ;;  %v185_v46 = vsel %vm174_vm0, %v173_v40, 0.0  ;;  %1226 = vrcp.f32 %v161_v44 }
 0x174   :  { %v184_v47 = vsel %vm174_vm0, %v172_v41, 0.0  ;;  %v163_v48 = vmul.f32 %v1221_v39, %v140_v45  ;;  %v220_v39 = vadd.f32 %v210_v30, %v193_v33 }
 0x175   :  { %v186_v50 = vadd.f32 %v185_v46, %v184_v47  ;;  %v1223_v51 = vpop.eup %1222  ;;  %v219_v46 = vadd.f32 %v218_v37, %v217_v26 }
 0x176   :  { %v143_v55 = vpop.xlane.xlu1 %142  ;;  %v1225_v56 = vpop.eup %1224  ;;  %v226_v57 = vmul.f32 %v163_v48, %v1506_v14  ;;  %v222_v48 = vmax.f32 %v220_v39, 0.0 }
 0x177   :  { %v187_v54 = vrot.slane %v186_v50, 4  ;;  %v165_v43 = vmul.f32 %v1223_v51, %v143_v55  ;;  %v146_v58 = vpop.xlane.xlu0 %145 }
 0x178   :  { %v167_v3 = vmul.f32 %v1225_v56, %v146_v58  ;;  %v230_v10 = vsel %vm174_vm0, %v226_v57, 0.0 }
 0x179   :  { %v188_v60 = vadd.f32 %v187_v54, %v186_v50  ;;  %v227_v62 = vmul.f32 %v165_v43, %v1516_v22  ;;  %v221_v54 = vadd.f32 %v219_v46, %v193_v33 }
 0x17a   :  { %v149_v17 = vpop.xlane.xlu1 %148  ;;  %v228_v19 = vmul.f32 %v167_v3, %v1506_v14  ;;  %v194_v14 = vadd.f32 %v193_v33, %v183_v25 }
 0x17b   :  { %v189_v7 = vrot.slane %v188_v60, 2  ;;  %v231_v11 = vsel %vm174_vm0, %v227_v62, 0.0  ;;  %v257_v56 = vpop.permute.xlu0 %256  ;;  %v223_v62 = vmax.f32 %v221_v54, 0.0 }
 0x17c   :  { %v232_v13 = vadd.f32 %v231_v11, %v230_v10  ;;  %v239_v28 = vsel %vm174_vm0, %v228_v19, 0.0  ;;  %v196_v42 = vmax.f32 %v194_v14, 0.0 }
 0x17d   :  { %v1227_v15 = vpop.eup %1226  ;;  %v190_v21 = vadd.f32 %v189_v7, %v188_v60 }
 0x17e   :  { %v233_v18 = vrot.slane %v232_v13, 4  ;;  %v169_v20 = vmul.f32 %v1227_v15, %v149_v17  ;;  %v259_v34 = vpop.permute.xlu1 %258  ;;  %v224_v52 = vadd.f32 %v222_v48, %v196_v42  ;;  %v497_v48 = vld [vmem:[#allocation2] ss:$8 sm:$0x3] }
 0x17f   :  { %v191_v31 = vrot.slane %v190_v21, 1 }
 0x180   :  { %v234_v23 = vadd.f32 %v233_v18, %v232_v13  ;;  %v229_v24 = vmul.f32 %v169_v20, %v1516_v22 }
 0x181   :  { %v192_v22 = vadd.f32 %v191_v31, %v190_v21 }
 0x182   :  { %v235_v27 = vrot.slane %v234_v23, 2  ;;  %v240_v29 = vsel %vm174_vm0, %v229_v24, 0.0  ;;  %v267_v47 = vpop.permute.xlu1 %266 }
 0x183   :  { %v241_v32 = vadd.f32 %v240_v29, %v239_v28  ;;  %v195_v51 = vadd.f32 %v193_v33, %v192_v22 }
 0x184   :  { %v236_v35 = vadd.f32 %v235_v27, %v234_v23 }
 0x185   :  { %v242_v36 = vrot.slane %v241_v32, 4  ;;  %v197_v43 = vmax.f32 %v195_v51, 0.0 }
 0x186   :  { %v237_v40 = vrot.slane %v236_v35, 1  ;;  %v269_v59 = vpop.permute.xlu1 %268 }
 0x187   :  { %v243_v41 = vadd.f32 %v242_v36, %v241_v32  ;;  %v225_v10 = vadd.f32 %v223_v62, %v197_v43 }
 0x188   :  { %v238_v44 = vadd.f32 %v237_v40, %v236_v35 }
 0x189   :  { %v244_v45 = vrot.slane %v243_v41, 2 }
 0x18a   :  { %v248_v49 = vadd.f32 %v238_v44, %v193_v33 }
 0x18b   :  { %v245_v50 = vadd.f32 %v244_v45, %v243_v41 }
 0x18c   :  { %v250_v53 = vmax.f32 %v248_v49, 0.0 }
 0x18d   :  { %v246_v55 = vrot.slane %v245_v50, 1 }
 0x18e   :  { %v252_v57 = vadd.f32 %v250_v53, %v224_v52 }
 0x18f   :  { %v247_v58 = vadd.f32 %v246_v55, %v245_v50  ;;  %v545_v50 = vld [vmem:[#allocation2 + $0x1] ss:$8 sm:$0x3] }
 0x190   :  { %v263_v60 = vmul.f32 %v259_v34, %v252_v57  ;;  %v262_v61 = vmul.f32 %v257_v56, %v252_v57  ;;  %v603_v57 = vld [vmem:[#allocation2 + $0x2] ss:$8 sm:$0x3] }
 0x191   :  { %v249_v63 = vadd.f32 %v247_v58, %v193_v33 }
 0x192   :  { %v272_v3 = vadd.f32 %v267_v47, %v262_v61  ;;  %v273_v7 = vadd.f32 %v269_v59, %v263_v60 }
 0x193   :  { %v251_v11 = vmax.f32 %v249_v63, 0.0 }
 0x194   :  { %v1160_v12 = vmul.f32 -1.442695, %v272_v3  ;;  %v1161_v13 = vmul.f32 -1.442695, %v273_v7 }
 0x195   :  { %v253_v15 = vadd.f32 %v251_v11, %v225_v10  ;;  %v661_v11 = vld [vmem:[#allocation2 + $0x3] ss:$8 sm:$0x3] }
 0x196   :  { %1228 = vpow2.f32 %v1160_v12 }
 0x197   :  { %v265_v16 = vmul.f32 %v259_v34, %v253_v15  ;;  %v264_v17 = vmul.f32 %v257_v56, %v253_v15  ;;  %1230 = vpow2.f32 %v1161_v13  ;;  %v1390_v34 = vmov 0.0  }
 0x198   :  { %407 = vmatprep.mubr.f32.mxu0 %v1390_v34  ;;  %484 = vmatprep.mubr.f32.mxu1 %v1390_v34 }
 0x199   :  { %v274_v18 = vadd.f32 %v267_v47, %v264_v17  ;;  %v275_v19 = vadd.f32 %v269_v59, %v265_v16 }
 0x19b   :  { %v1162_v20 = vmul.f32 -1.442695, %v274_v18  ;;  %v1163_v38 = vmul.f32 -1.442695, %v275_v19 }
 0x19c   :  { %v719_v18 = vld [vmem:[#allocation2 + $0x5] ss:$8 sm:$0x3] }
 0x19d   :  { %1232 = vpow2.f32 %v1162_v20 }
 0x19e   :  { %1234 = vpow2.f32 %v1163_v38 }
 0x1a0   :  { %v1229_v21 = vpop.eup %1228 }
 0x1a1   :  { %v1231_v23 = vpop.eup %1230  ;;  %v288_v24 = vadd.f32 1.0, %v1229_v21 }
 0x1a2   :  { %v289_v25 = vadd.f32 1.0, %v1231_v23 }
 0x1a3   :  { %1236 = vrcp.f32 %v288_v24  ;;  %v777_v24 = vld [vmem:[#allocation2 + $0x6] ss:$8 sm:$0x3] }
 0x1a4   :  { %1238 = vrcp.f32 %v289_v25 }
 0x1a7   :  { %v1233_v26 = vpop.eup %1232 }
 0x1a8   :  { %v1235_v27 = vpop.eup %1234  ;;  %v290_v28 = vadd.f32 1.0, %v1233_v26 }
 0x1a9   :  { %v291_v29 = vadd.f32 1.0, %v1235_v27 }
 0x1aa   :  { %1240 = vrcp.f32 %v290_v28 }
 0x1ab   :  { %1242 = vrcp.f32 %v291_v29 }
 0x1ad   :  { %v1237_v30 = vpop.eup %1236 }
 0x1ae   :  { %v1239_v31 = vpop.eup %1238  ;;  %300 = vst.msk [vmem:[%s1895_s6] sm:$0xff] %vm174_vm0, %v1237_v30  ;;  %306 = vperm.xlu0 %1202, %v1237_v30   ;;  %v835_v30 = vld [vmem:[#allocation2 + $0x7] ss:$8 sm:$0x3] }
 0x1af   :  { %301 = vst.msk [vmem:[%s1895_s6 + $0x8] sm:$0xff] %vm174_vm0, %v1239_v31  ;;  %311 = vperm.xlu1 %1203, %v1239_v31  }
 0x1b4   :  { %v1241_v32 = vpop.eup %1240 }
 0x1b5   :  { %v1243_v33 = vpop.eup %1242  ;;  %302 = vst.msk [vmem:[%s1895_s6 + $0x10] sm:$0xff] %vm174_vm0, %v1241_v32  ;;  %316 = vperm.xlu1 %1203, %v1241_v32  }
 0x1b6   :  { %303 = vst.msk [vmem:[%s1895_s6 + $0x18] sm:$0xff] %vm174_vm0, %v1243_v33  ;;  %321 = vperm.xlu0 %1202, %v1243_v33  }
 0x22d   :  { %v307_v35 = vpop.permute.xlu0 %306 }
 0x22e   :  { %v312_v14 = vpop.permute.xlu1 %311  ;;  %v1588_v36 = vmul.f32 %v307_v35, %v1479_v2  ;;  %v1591_v37 = vmul.f32 %v307_v35, %v1483_v4  ;;  %v334_v2 = vld [vmem:[%s1890_s1] sm:$0xff] }
 0x22f   :  { %v1594_v39 = vmul.f32 %v312_v14, %v1491_v8  ;;  %v1597_v40 = vmul.f32 %v312_v14, %v1493_v9 }
 0x231   :  { %v1174_v41 = vpack.c.bf16 %v1597_v40, %v1591_v37  ;;  %v1176_v22 = vpack.c.bf16 %v1594_v39, %v1588_v36 }
 0x233   :  { %1175 = vmatprep.subr.bf16.mxu0 %v1174_v41 }
 0x234   :  { %1177 = vmatpush1.bf16.msra.mxu0 %v1176_v22  ;;  %v317_v42 = vpop.permute.xlu1 %316 }
 0x235   :  { %v1607_v4 = vmul.f32 %v317_v42, %v1475_v0  ;;  %v1610_v8 = vmul.f32 %v317_v42, %v1477_v1  ;;  %v322_v9 = vpop.permute.xlu0 %321  ;;  %v335_v0 = vld [vmem:[%s1890_s1 + $0x8] sm:$0xff]  ;;  %v499_v1 = vlaneseq  ;;  %s1391_s1 = smov 17  }
 0x236   :  { %v1613_v44 = vmul.f32 %v322_v9, %v1485_v5  ;;  %v1616_v45 = vmul.f32 %v322_v9, %v1487_v6 }
 0x237   :  { %1166 = vmatmul.mubr.msk.f32.vlgmr.msra.gmra.mrb[0].mxu0 %vm336_vm1, %v334_v2  ;;  %v1630_v5 = vshrl.u32 %v499_v1, 7  ;;  %vm1841_vm11 = vcmp.lt.s32.totalorder %v499_v1, 256 }
 0x238   :  { %v1178_v46 = vpack.c.bf16 %v1616_v45, %v1610_v8  ;;  %v1180_v47 = vpack.c.bf16 %v1613_v44, %v1607_v4  ;;  %413 = vmatprep.mubr.f32.mxu0 %v1390_v34 }
 0x239   :  { %v1633_v6 = vsub.s32 0, %v1630_v5  ;;  %v1636_v49 = vsub.s32 1, %v1630_v5 }
 0x23a   :  { %1179 = vmatprep.subr.bf16.mxu1 %v1178_v46 }
 0x23b   :  { %1181 = vmatpush1.bf16.msra.mxu1 %v1180_v47  ;;  %1167 = vmatmul.mubr.msk.f32.gmra.mrb[2].mxu0 %vm336_vm1, %v335_v0  ;;  %v502_v51 = vrot.slane %v497_v48, %v1633_v6  ;;  %v506_v52 = vrot.slane %v497_v48, %v1636_v49  ;;  %v550_v53 = vrot.slane %v545_v50, %v1633_v6 }
 0x23c   :  { %v608_v60 = vrot.slane %v603_v57, %v1633_v6  ;;  %v666_v13 = vrot.slane %v661_v11, %v1633_v6  ;;  %v724_v38 = vrot.slane %v719_v18, %v1633_v6  ;;  %v782_v27 = vrot.slane %v777_v24, %v1633_v6 }
 0x23d   :  { %v840_v33 = vrot.slane %v835_v30, %v1633_v6  ;;  %v554_v22 = vrot.slane %v545_v50, %v1636_v49  ;;  %v612_v47 = vrot.slane %v603_v57, %v1636_v49  ;;  %v670_v50 = vrot.slane %v661_v11, %v1636_v49 }
 0x23e   :  { %1168 = vmatmul.mubr.msk.f32.vlgmr.msra.gmra.mrb[0].mxu1 %vm336_vm1, %v334_v2  ;;  %v728_v57 = vrot.slane %v719_v18, %v1636_v49  ;;  %v786_v11 = vrot.slane %v777_v24, %v1636_v49  ;;  %v844_v18 = vrot.slane %v835_v30, %v1636_v49 }
 0x23f   :  { %490 = vmatprep.mubr.f32.mxu1 %v1390_v34 }
 0x242   :  { %1169 = vmatmul.mubr.msk.f32.gmra.mrb[2].mxu1 %vm336_vm1, %v335_v0 }
 0x30a   :  { %v1641_v54 = vpop.f32.mrb[0].mxu0 }
 0x30b   :  { %v509_v55 = vmul.f32 %v502_v51, %v1641_v54  ;;  %v1644_v56 = vpop.f32.mrb[1].mxu0  ;;  %v557_v58 = vmul.f32 %v550_v53, %v1641_v54  ;;  %v615_v3 = vmul.f32 %v608_v60, %v1641_v54  ;;  %v673_v20 = vmul.f32 %v666_v13, %v1641_v54 }
 0x30c   :  { %v510_v43 = vmul.f32 %v506_v52, %v1644_v56  ;;  %v731_v26 = vmul.f32 %v724_v38, %v1641_v54  ;;  %v789_v32 = vmul.f32 %v782_v27, %v1641_v54  ;;  %v847_v41 = vmul.f32 %v840_v33, %v1641_v54 }
 0x30d   :  { %513 = vrot.lane.b32.xlu1 %v509_v55, %s1391_s1  ;;  %v565_v63 = vrot.slane %v557_v58, 1  ;;  %v623_v12 = vrot.slane %v615_v3, 2  ;;  %v681_v25 = vrot.slane %v673_v20, 3  ;;  %v558_v46 = vmul.f32 %v554_v22, %v1644_v56 }
 0x30e   :  { %v1648_v59 = vpop.f32.mrb[2].mxu0  ;;  %v739_v31 = vrot.slane %v731_v26, 5  ;;  %v797_v14 = vrot.slane %v789_v32, 6  ;;  %v855_v9 = vrot.slane %v847_v41, 7  ;;  %v674_v58 = vmul.f32 %v670_v50, %v1644_v56 }
 0x30f   :  { %v1651_v61 = vpop.f32.mrb[3].mxu0 }
 0x310   :  { %v682_v3 = vrot.slane %v674_v58, 3 }
 0x311   :  { %517 = vrot.lane.b32.xlu1 %v510_v43, %s1391_s1  ;;  %v1653_v62 = vpop.f32.mrb[0].mxu1 }
 0x312   :  { %v1656_v7 = vpop.f32.mrb[1].mxu1  ;;  %v511_v10 = vmul.f32 %v502_v51, %v1653_v62  ;;  %v559_v17 = vmul.f32 %v550_v53, %v1653_v62  ;;  %v617_v23 = vmul.f32 %v608_v60, %v1653_v62  ;;  %v675_v29 = vmul.f32 %v666_v13, %v1653_v62 }
 0x313   :  { %v512_v16 = vmul.f32 %v506_v52, %v1656_v7  ;;  %v733_v35 = vmul.f32 %v724_v38, %v1653_v62  ;;  %v791_v2 = vmul.f32 %v782_v27, %v1653_v62  ;;  %v849_v48 = vmul.f32 %v840_v33, %v1653_v62 }
 0x314   :  { %515 = vrot.lane.b32.xlu0 %v511_v10, %s1391_s1  ;;  %v567_v21 = vrot.slane %v559_v17, 1  ;;  %v625_v28 = vrot.slane %v617_v23, 2  ;;  %v683_v34 = vrot.slane %v675_v29, 3  ;;  %v566_v51 = vrot.slane %v558_v46, 1 }
 0x315   :  { %573 = vrot.lane.b32.xlu1 %v565_v63, %s1384_s14  ;;  %v1661_v15 = vpop.f32.mrb[2].mxu1  ;;  %v741_v42 = vrot.slane %v733_v35, 5  ;;  %v799_v0 = vrot.slane %v791_v2, 6  ;;  %v616_v52 = vmul.f32 %v612_v47, %v1644_v56  ;;  %v857_v53 = vrot.slane %v849_v48, 7 }
 0x316   :  { %v1665_v19 = vpop.f32.mrb[3].mxu1  ;;  %v560_v55 = vmul.f32 %v554_v22, %v1656_v7  ;;  %v618_v63 = vmul.f32 %v612_v47, %v1656_v7  ;;  %v732_v10 = vmul.f32 %v728_v57, %v1644_v56  ;;  %v676_v13 = vmul.f32 %v670_v50, %v1656_v7 }
 0x317   :  { %v624_v43 = vrot.slane %v616_v52, 2  ;;  %v790_v17 = vmul.f32 %v786_v11, %v1644_v56  ;;  %v734_v38 = vmul.f32 %v728_v57, %v1656_v7  ;;  %v792_v27 = vmul.f32 %v786_v11, %v1656_v7 }
 0x318   :  { %519 = vrot.lane.b32.xlu0 %v512_v16, %s1391_s1  ;;  %v568_v60 = vrot.slane %v560_v55, 1  ;;  %v740_v16 = vrot.slane %v732_v10, 5  ;;  %v684_v20 = vrot.slane %v676_v13, 3  ;;  %v850_v32 = vmul.f32 %v844_v18, %v1656_v7 }
 0x319   :  { %631 = vrot.lane.b32.xlu1 %v623_v12, %s1392_s24  ;;  %v626_v12 = vrot.slane %v618_v63, 2  ;;  %v798_v23 = vrot.slane %v790_v17, 6  ;;  %v742_v26 = vrot.slane %v734_v38, 5 }
 0x31a   :  { %v858_v33 = vrot.slane %v850_v32, 7 }
 0x31c   :  { %575 = vrot.lane.b32.xlu0 %v567_v21, %s1384_s14  ;;  %v893_v21 = vld [vmem:[#allocation2 + $0x10] ss:$8 sm:$0x3] }
 0x31d   :  { %689 = vrot.lane.b32.xlu1 %v681_v25, %s1393_s26  ;;  %v848_v25 = vmul.f32 %v844_v18, %v1644_v56  ;;  %v898_v24 = vrot.slane %v893_v21, %v1633_v6  ;;  %v902_v30 = vrot.slane %v893_v21, %v1636_v49 }
 0x31f   :  { %v905_v29 = vmul.f32 %v898_v24, %v1648_v59  ;;  %v906_v6 = vmul.f32 %v902_v30, %v1651_v61  ;;  %v908_v59 = vmul.f32 %v902_v30, %v1665_v19  ;;  %v1733_v19 = vand.u32 127, %v499_v1 }
 0x320   :  { %633 = vrot.lane.b32.xlu0 %v625_v28, %s1392_s24  ;;  %v856_v28 = vrot.slane %v848_v25, 7 }
 0x321   :  { %747 = vrot.lane.b32.xlu1 %v739_v31, %s1387_s0  ;;  %v800_v31 = vrot.slane %v792_v27, 6  ;;  %vm523_vm2 = vcmp.lt.s32.totalorder %v1733_v19, 17  ;;  %vm581_vm3 = vcmp.lt.s32.totalorder %v1733_v19, 16  ;;  %vm639_vm4 = vcmp.lt.s32.totalorder %v1733_v19, 15 }
 0x322   :  { %vm697_vm5 = vcmp.lt.s32.totalorder %v1733_v19, 1  ;;  %vm755_vm6 = vcmp.lt.s32.totalorder %v1733_v19, 127  ;;  %vm813_vm7 = vcmp.lt.s32.totalorder %v1733_v19, 113  ;;  %vm871_vm8 = vcmp.lt.s32.totalorder %v1733_v19, 112 }
 0x323   :  { %vm917_vm9 = vcmp.lt.s32.totalorder %v1733_v19, 111 }
 0x324   :  { %691 = vrot.lane.b32.xlu0 %v683_v34, %s1393_s26  ;;  %v907_v34 = vmul.f32 %v898_v24, %v1661_v15 }
 0x325   :  { %805 = vrot.lane.b32.xlu1 %v797_v14, %s1394_s2 }
 0x328   :  { %749 = vrot.lane.b32.xlu0 %v741_v42, %s1387_s0 }
 0x329   :  { %863 = vrot.lane.b32.xlu1 %v855_v9, %s1395_s25 }
 0x32c   :  { %807 = vrot.lane.b32.xlu0 %v799_v0, %s1394_s2 }
 0x32d   :  { %577 = vrot.lane.b32.xlu1 %v566_v51, %s1384_s14 }
 0x330   :  { %865 = vrot.lane.b32.xlu0 %v857_v53, %s1395_s25 }
 0x331   :  { %635 = vrot.lane.b32.xlu1 %v624_v43, %s1392_s24 }
 0x334   :  { %579 = vrot.lane.b32.xlu0 %v568_v60, %s1384_s14 }
 0x335   :  { %693 = vrot.lane.b32.xlu1 %v682_v3, %s1393_s26 }
 0x338   :  { %637 = vrot.lane.b32.xlu0 %v626_v12, %s1392_s24 }
 0x339   :  { %751 = vrot.lane.b32.xlu1 %v740_v16, %s1387_s0 }
 0x33c   :  { %695 = vrot.lane.b32.xlu0 %v684_v20, %s1393_s26 }
 0x33d   :  { %809 = vrot.lane.b32.xlu1 %v798_v23, %s1394_s2 }
 0x340   :  { %753 = vrot.lane.b32.xlu0 %v742_v26, %s1387_s0  ;;  %s1328_s0 = scalar_lea.vmem %s1127_s30, 1024 }
 0x341   :  { %867 = vrot.lane.b32.xlu1 %v856_v28, %s1395_s25  ;;  %p1329_p7 = scmp.ne.s32.totalorder %s1127_s30, %s1328_s0  ;;  %p1334_p9 = scmp.lt.s32.totalorder %s1328_s0, %s1328_s0 }
 0x343   :  { %p1335_p10 = por %p1334_p9, %p1333_p8 }
 0x344   :  { %811 = vrot.lane.b32.xlu0 %v800_v31, %s1394_s2 }
 0x345   :  { %909 = vrot.lane.b32.xlu1 %v905_v29, %s1396_s27  ;;  %p1336_p11 = pnand %p1335_p10, %p1329_p7 }
 0x348   :  { %869 = vrot.lane.b32.xlu0 %v858_v33, %s1395_s25 }
 0x349   :  { %913 = vrot.lane.b32.xlu1 %v906_v6, %s1396_s27 }
 0x34c   :  { %911 = vrot.lane.b32.xlu0 %v907_v34, %s1396_s27 }
 0x350   :  { %915 = vrot.lane.b32.xlu0 %v908_v59, %s1396_s27 }
 0x37f   :  { %v514_v49 = vpop.permute.xlu1 %513 }
 0x383   :  { %v518_v35 = vpop.permute.xlu1 %517 }
 0x384   :  { %v524_v55 = vsel %vm523_vm2, %v514_v49, %v518_v35  ;;  %v526_v43 = vsel %vm523_vm2, %v518_v35, %v514_v49 }
 0x385   :  { %v532_v60 = vrot.slane %v526_v43, 4  ;;  %v533_v63 = vrot.slane %v524_v55, 4 }
 0x386   :  { %v516_v14 = vpop.permute.xlu0 %515 }
 0x387   :  { %v574_v41 = vpop.permute.xlu1 %573  ;;  %v540_v21 = vadd.f32 %v532_v60, %v1641_v54  ;;  %v541_v23 = vadd.f32 %v533_v63, %v1644_v56 }
 0x38a   :  { %v520_v22 = vpop.permute.xlu0 %519 }
 0x38b   :  { %v632_v42 = vpop.permute.xlu1 %631  ;;  %v525_v16 = vsel %vm523_vm2, %v516_v14, %v520_v22  ;;  %v527_v17 = vsel %vm523_vm2, %v520_v22, %v516_v14 }
 0x38c   :  { %v534_v28 = vrot.slane %v527_v17, 4  ;;  %v535_v29 = vrot.slane %v525_v16, 4 }
 0x38e   :  { %v576_v2 = vpop.permute.xlu0 %575 }
 0x38f   :  { %v690_v9 = vpop.permute.xlu1 %689 }
 0x392   :  { %v634_v46 = vpop.permute.xlu0 %633 }
 0x393   :  { %v748_v61 = vpop.permute.xlu1 %747 }
 0x396   :  { %v1726_v47 = vpop.permute.xlu0 %691 }
 0x397   :  { %v806_v0 = vpop.permute.xlu1 %805 }
 0x39a   :  { %v1728_v48 = vpop.permute.xlu0 %749 }
 0x39b   :  { %v1730_v15 = vpop.permute.xlu1 %863 }
 0x39e   :  { %v1735_v51 = vpop.permute.xlu0 %807 }
 0x39f   :  { %v578_v52 = vpop.permute.xlu1 %577 }
 0x3a0   :  { %v582_v3 = vsel %vm581_vm3, %v574_v41, %v578_v52  ;;  %v584_v10 = vsel %vm581_vm3, %v578_v52, %v574_v41 }
 0x3a1   :  { %v590_v18 = vrot.slane %v584_v10, 4  ;;  %v591_v20 = vrot.slane %v582_v3, 4 }
 0x3a2   :  { %v1738_v50 = vpop.permute.xlu0 %865 }
 0x3a3   :  { %v636_v53 = vpop.permute.xlu1 %635  ;;  %v598_v31 = vadd.f32 %v590_v18, %v540_v21  ;;  %v599_v32 = vadd.f32 %v591_v20, %v541_v23 }
 0x3a4   :  { %v640_v11 = vsel %vm639_vm4, %v632_v42, %v636_v53  ;;  %v642_v12 = vsel %vm639_vm4, %v636_v53, %v632_v42 }
 0x3a5   :  { %v648_v25 = vrot.slane %v642_v12, 4  ;;  %v649_v24 = vrot.slane %v640_v11, 4 }
 0x3a6   :  { %v580_v58 = vpop.permute.xlu0 %579 }
 0x3a7   :  { %v694_v57 = vpop.permute.xlu1 %693  ;;  %v583_v54 = vsel %vm581_vm3, %v576_v2, %v580_v58  ;;  %v585_v56 = vsel %vm581_vm3, %v580_v58, %v576_v2  ;;  %v656_v35 = vadd.f32 %v648_v25, %v598_v31  ;;  %v657_v14 = vadd.f32 %v649_v24, %v599_v32 }
 0x3a8   :  { %v698_v26 = vsel %vm697_vm5, %v690_v9, %v694_v57  ;;  %v700_v27 = vsel %vm697_vm5, %v694_v57, %v690_v9  ;;  %v592_v41 = vrot.slane %v585_v56, 4  ;;  %v593_v22 = vrot.slane %v583_v54, 4 }
 0x3a9   :  { %v706_v33 = vrot.slane %v700_v27, 4  ;;  %v707_v34 = vrot.slane %v698_v26, 4  ;;  %v542_v58 = vadd.f32 %v534_v28, %v1653_v62  ;;  %v543_v57 = vadd.f32 %v535_v29, %v1656_v7 }
 0x3aa   :  { %v638_v13 = vpop.permute.xlu0 %637  ;;  %v938_v27 = vstv %s1776_s28 }
 0x3ab   :  { %v752_v38 = vpop.permute.xlu1 %751  ;;  %v641_v42 = vsel %vm639_vm4, %v634_v46, %v638_v13  ;;  %v643_v2 = vsel %vm639_vm4, %v638_v13, %v634_v46  ;;  %v714_v60 = vadd.f32 %v706_v33, %v656_v35  ;;  %v715_v63 = vadd.f32 %v707_v34, %v657_v14 }
 0x3ac   :  { %v756_v59 = vsel %vm755_vm6, %v748_v61, %v752_v38  ;;  %v758_v49 = vsel %vm755_vm6, %v752_v38, %v748_v61  ;;  %v650_v3 = vrot.slane %v643_v2, 4  ;;  %v651_v10 = vrot.slane %v641_v42, 4 }
 0x3ad   :  { %v764_v52 = vrot.slane %v756_v59, 4  ;;  %v765_v53 = vrot.slane %v758_v49, 4  ;;  %v600_v12 = vadd.f32 %v592_v41, %v542_v58  ;;  %v601_v13 = vadd.f32 %v593_v22, %v543_v57 }
 0x3ae   :  { %v696_v30 = vpop.permute.xlu0 %695 }
 0x3af   :  { %v810_v6 = vpop.permute.xlu1 %809  ;;  %v772_v17 = vadd.f32 %v764_v52, %v714_v60  ;;  %v773_v7 = vadd.f32 %v765_v53, %v715_v63  ;;  %v699_v18 = vsel %vm697_vm5, %v1726_v47, %v696_v30  ;;  %v701_v20 = vsel %vm697_vm5, %v696_v30, %v1726_v47 }
 0x3b0   :  { %v814_v61 = vsel %vm813_vm7, %v806_v0, %v810_v6  ;;  %v816_v55 = vsel %vm813_vm7, %v810_v6, %v806_v0  ;;  %v658_v24 = vadd.f32 %v650_v3, %v600_v12  ;;  %v659_v26 = vadd.f32 %v651_v10, %v601_v13 }
 0x3b1   :  { %v822_v0 = vrot.slane %v814_v61, 4  ;;  %v823_v16 = vrot.slane %v816_v55, 4  ;;  %v708_v28 = vrot.slane %v701_v20, 4  ;;  %v709_v29 = vrot.slane %v699_v18, 4 }
 0x3b2   :  { %v754_v9 = vpop.permute.xlu0 %753 }
 0x3b3   :  { %v868_v43 = vpop.permute.xlu1 %867  ;;  %v759_v21 = vsel %vm755_vm6, %v754_v9, %v1728_v48  ;;  %v830_v31 = vadd.f32 %v822_v0, %v772_v17  ;;  %v831_v47 = vadd.f32 %v823_v16, %v773_v7  ;;  %v717_v42 = vadd.f32 %v709_v29, %v659_v26 }
 0x3b4   :  { %v872_v46 = vsel %vm871_vm8, %v1730_v15, %v868_v43  ;;  %v874_v11 = vsel %vm871_vm8, %v868_v43, %v1730_v15  ;;  %v757_v15 = vsel %vm755_vm6, %v1728_v48, %v754_v9  ;;  %v767_v54 = vrot.slane %v759_v21, 4 }
 0x3b5   :  { %v880_v23 = vrot.slane %v872_v46, 4  ;;  %v881_v25 = vrot.slane %v874_v11, 4  ;;  %v766_v32 = vrot.slane %v757_v15, 4  ;;  %v947_v11 = vstv %s1165_s29 }
 0x3b6   :  { %v812_v62 = vpop.permute.xlu0 %811  ;;  %v775_v43 = vadd.f32 %v767_v54, %v717_v42 }
 0x3b7   :  { %v910_v38 = vpop.permute.xlu1 %909  ;;  %v815_v56 = vsel %vm813_vm7, %v1735_v51, %v812_v62  ;;  %v817_v48 = vsel %vm813_vm7, %v812_v62, %v1735_v51  ;;  %v888_v33 = vadd.f32 %v880_v23, %v830_v31  ;;  %v889_v34 = vadd.f32 %v881_v25, %v831_v47 }
 0x3b8   :  { %v716_v51 = vadd.f32 %v708_v28, %v658_v24  ;;  %v824_v2 = vrot.slane %v815_v56, 4  ;;  %v825_v9 = vrot.slane %v817_v48, 4 }
 0x3ba   :  { %v870_v30 = vpop.permute.xlu0 %869  ;;  %v774_v55 = vadd.f32 %v766_v32, %v716_v51  ;;  %v833_v10 = vadd.f32 %v825_v9, %v775_v43 }
 0x3bb   :  { %v914_v6 = vpop.permute.xlu1 %913  ;;  %v873_v35 = vsel %vm871_vm8, %v1738_v50, %v870_v30  ;;  %v875_v14 = vsel %vm871_vm8, %v870_v30, %v1738_v50 }
 0x3bc   :  { %v918_v59 = vsel %vm917_vm9, %v910_v38, %v914_v6  ;;  %v920_v49 = vsel %vm917_vm9, %v914_v6, %v910_v38  ;;  %v882_v58 = vrot.slane %v873_v35, 4  ;;  %v883_v57 = vrot.slane %v875_v14, 4 }
 0x3bd   :  { %v926_v41 = vrot.slane %v918_v59, 4  ;;  %v927_v22 = vrot.slane %v920_v49, 4  ;;  %v832_v3 = vadd.f32 %v824_v2, %v774_v55 }
 0x3be   :  { %v912_v52 = vpop.permute.xlu0 %911  ;;  %v891_v62 = vadd.f32 %v883_v57, %v833_v10 }
 0x3bf   :  { %v934_v53 = vadd.f32 %v926_v41, %v888_v33  ;;  %v935_v61 = vadd.f32 %v927_v22, %v889_v34  ;;  %v890_v16 = vadd.f32 %v882_v58, %v832_v3 }
 0x3c1   :  { %v939_v60 = vadd.f32 %v938_v27, %v934_v53  ;;  %v940_v63 = vadd.f32 %v938_v27, %v935_v61 }
 0x3c2   :  { %v916_v46 = vpop.permute.xlu0 %915 }
 0x3c3   :  { %v943_v50 = vmax.f32 %v939_v60, 0.0  ;;  %v944_v12 = vmax.f32 %v940_v63, 0.0  ;;  %v919_v13 = vsel %vm917_vm9, %v912_v52, %v916_v46  ;;  %v921_v0 = vsel %vm917_vm9, %v916_v46, %v912_v52 }
 0x3c4   :  { %v928_v17 = vrot.slane %v919_v13, 4  ;;  %v929_v7 = vrot.slane %v921_v0, 4 }
 0x3c5   :  { %v948_v18 = vmul.f32 %v947_v11, %v943_v50  ;;  %v949_v20 = vmul.f32 %v947_v11, %v944_v12 }
 0x3c6   :  { %v936_v38 = vadd.f32 %v928_v17, %v890_v16  ;;  %v937_v15 = vadd.f32 %v929_v7, %v891_v62 }
 0x3c7   :  { %v952_v21 = vmax.f32 %v948_v18, 0.0  ;;  %v953_v23 = vmax.f32 %v949_v20, 0.0 }
 0x3c8   :  { %v941_v25 = vadd.f32 %v938_v27, %v936_v38  ;;  %v942_v24 = vadd.f32 %v938_v27, %v937_v15 }
 0x3c9   :  { %v967_v26 = vsel %vm956_vm10, %v952_v21, 0.0  ;;  %v968_v28 = vsel %vm956_vm10, %v953_v23, 0.0  ;;  %v957_v33 = vsel %vm956_vm10, %v952_v21, -inf  ;;  %v958_v27 = vsel %vm956_vm10, %v953_v23, -inf }
 0x3ca   :  { %v945_v29 = vmax.f32 %v941_v25, 0.0  ;;  %v946_v19 = vmax.f32 %v942_v24, 0.0  ;;  %v969_v31 = vadd.f32 %v968_v28, %v967_v26  ;;  %v959_v34 = vmax.f32 %v957_v33, %v958_v27 }
 0x3cc   :  { %970 = vadd.xlane.f32.xlu1 %v969_v31  ;;  %v950_v47 = vmul.f32 %v947_v11, %v945_v29  ;;  %v951_v30 = vmul.f32 %v947_v11, %v946_v19 }
 0x3ce   :  { %v954_v32 = vmax.f32 %v950_v47, 0.0  ;;  %v955_v54 = vmax.f32 %v951_v30, 0.0 }
 0x3d0   :  { %v972_v56 = vsel %vm956_vm10, %v954_v32, 0.0  ;;  %v973_v48 = vsel %vm956_vm10, %v955_v54, 0.0  ;;  %v962_v59 = vsel %vm956_vm10, %v954_v32, -inf  ;;  %v963_v49 = vsel %vm956_vm10, %v955_v54, -inf }
 0x3d1   :  { %v974_v6 = vadd.f32 %v973_v48, %v972_v56  ;;  %v964_v35 = vmax.f32 %v962_v59, %v963_v49 }
 0x3d3   :  { %975 = vadd.xlane.f32.xlu0 %v974_v6 }
 0x3d7   :  { %960 = vmax.xlane.f32.xlu0 %v959_v34 }
 0x3db   :  { %965 = vmax.xlane.f32.xlu0 %v964_v35 }
 0x459   :  { %v971_v14 = vpop.xlane.xlu1 %970 }
 0x45a   :  { %v977_v41 = vmul.f32 0.00390625, %v971_v14 }
 0x45c   :  { %v989_v51 = vadd.f32 1e-07, %v977_v41 }
 0x45e   :  { %1244 = vrcp.f32 %v989_v51  ;;  %v1397_v51 = vmov 1966171168  }
 0x460   :  { %v976_v22 = vpop.xlane.xlu0 %975 }
 0x461   :  { %v978_v42 = vmul.f32 0.00390625, %v976_v22 }
 0x463   :  { %v990_v53 = vadd.f32 1e-07, %v978_v42 }
 0x464   :  { %v961_v2 = vpop.xlane.xlu0 %960 }
 0x465   :  { %v981_v9 = vsub.f32 %v961_v2, %v977_v41  ;;  %v1001_v52 = vadd.f32 1e-07, %v961_v2  ;;  %v979_v63 = vadd.f32 %v977_v41, %v961_v2 }
 0x467   :  { %v983_v61 = vadd.f32 1e-07, %v981_v9 }
 0x468   :  { %v966_v55 = vpop.xlane.xlu0 %965  ;;  %v1245_v60 = vpop.eup %1244 }
 0x469   :  { %1246 = vrcp.f32 %v983_v61  ;;  %v982_v43 = vsub.f32 %v966_v55, %v978_v42  ;;  %v1002_v58 = vadd.f32 1e-07, %v966_v55  ;;  %v992_v11 = vmul.f32 %v1245_v60, %v961_v2 }
 0x46a   :  { %1248 = vrcp.f32 %v1001_v52  ;;  %v980_v13 = vadd.f32 %v978_v42, %v966_v55  ;;  %v1049_v42 = vunpack.c.l.s4 %v1397_v51  ;;  %v1091_v52 = vsub.s32 4, %v1630_v5 }
 0x46b   :  { %1250 = vrcp.f32 %v990_v53  ;;  %v984_v57 = vadd.f32 1e-07, %v982_v43 }
 0x46c   :  { %v1050_v9 = vunpack.c.0.s8 %v1049_v42 }
 0x46d   :  { %1252 = vrcp.f32 %v984_v57 }
 0x46e   :  { %1254 = vrcp.f32 %v1002_v58  ;;  %v1053_v61 = vsub.s32 %v1050_v9, %v1630_v5 }
 0x473   :  { %v1247_v3 = vpop.eup %1246 }
 0x474   :  { %v1249_v10 = vpop.eup %1248  ;;  %v986_v46 = vmul.f32 %v1247_v3, %v979_v63 }
 0x475   :  { %v1251_v50 = vpop.eup %1250  ;;  %v1005_v16 = vmul.f32 %v1249_v10, %v952_v21  ;;  %v1006_v7 = vmul.f32 %v1249_v10, %v953_v23 }
 0x476   :  { %v995_v12 = vadd.f32 %v992_v11, %v986_v46  ;;  %v994_v20 = vmul.f32 %v1251_v50, %v966_v55 }
 0x477   :  { %v1253_v0 = vpop.eup %1252  ;;  %v1009_v25 = vmul.f32 %v1005_v16, %v1005_v16  ;;  %v1010_v26 = vmul.f32 %v1006_v7, %v1006_v7 }
 0x478   :  { %v1255_v62 = vpop.eup %1254  ;;  %v997_v17 = vmul.f32 0.5, %v995_v12  ;;  %v988_v18 = vmul.f32 %v1253_v0, %v980_v13 }
 0x479   :  { %v1007_v24 = vmul.f32 %v1255_v62, %v954_v32  ;;  %v1008_v19 = vmul.f32 %v1255_v62, %v955_v54 }
 0x47a   :  { %v999_v38 = vadd.f32 1.0, %v997_v17  ;;  %v996_v15 = vadd.f32 %v994_v20, %v988_v18 }
 0x47b   :  { %v1011_v56 = vmul.f32 %v1007_v24, %v1007_v24  ;;  %v1012_v21 = vmul.f32 %v1008_v19, %v1008_v19 }
 0x47c   :  { %v1013_v28 = vadd.f32 1.0, %v999_v38  ;;  %v998_v29 = vmul.f32 0.5, %v996_v15 }
 0x47e   :  { %v1015_v31 = vmul.f32 %v1013_v28, %v1009_v25  ;;  %v1016_v47 = vmul.f32 %v1013_v28, %v1010_v26  ;;  %v1000_v30 = vadd.f32 1.0, %v998_v29 }
 0x480   :  { %v1170_v48 = vmul.f32 -1.442695, %v1015_v31  ;;  %v1171_v6 = vmul.f32 -1.442695, %v1016_v47  ;;  %v1014_v33 = vadd.f32 1.0, %v1000_v30 }
 0x482   :  { %1256 = vpow2.f32 %v1170_v48  ;;  %v1017_v23 = vmul.f32 %v1014_v33, %v1011_v56  ;;  %v1018_v27 = vmul.f32 %v1014_v33, %v1012_v21 }
 0x483   :  { %1258 = vpow2.f32 %v1171_v6 }
 0x484   :  { %v1172_v34 = vmul.f32 -1.442695, %v1017_v23  ;;  %v1173_v59 = vmul.f32 -1.442695, %v1018_v27 }
 0x486   :  { %1260 = vpow2.f32 %v1172_v34 }
 0x487   :  { %1262 = vpow2.f32 %v1173_v59 }
 0x48c   :  { %v1257_v32 = vpop.eup %1256 }
 0x48d   :  { %v1259_v49 = vpop.eup %1258  ;;  %v1031_v35 = vadd.f32 1.0, %v1257_v32 }
 0x48e   :  { %v1032_v54 = vadd.f32 1.0, %v1259_v49 }
 0x48f   :  { %1264 = vrcp.f32 %v1031_v35 }
 0x490   :  { %v1261_v14 = vpop.eup %1260  ;;  %1266 = vrcp.f32 %v1032_v54 }
 0x491   :  { %v1263_v41 = vpop.eup %1262  ;;  %v1033_v22 = vadd.f32 1.0, %v1261_v14 }
 0x492   :  { %v1034_v2 = vadd.f32 1.0, %v1263_v41 }
 0x493   :  { %1268 = vrcp.f32 %v1033_v22 }
 0x494   :  { %1270 = vrcp.f32 %v1034_v2 }
 0x499   :  { %v1265_v53 = vpop.eup %1264 }
 0x49a   :  { %v1267_v55 = vpop.eup %1266  ;;  %v1085_v43 = vadd.f32 1.0, %v1265_v53 }
 0x49b   :  { %v1086_v58 = vadd.f32 1.0, %v1267_v55  ;;  %v1047_v57 = vcombine.high %v1265_v53, %v1267_v55 }
 0x49c   :  { %v1092_v60 = vrot.slane %v1085_v43, %v1091_v52 }
 0x49d   :  { %v1269_v63 = vpop.eup %1268  ;;  %v1096_v3 = vrot.slane %v1086_v58, %v1091_v52  ;;  %v1054_v10 = vrot.slane %v1047_v57, %v1053_v61 }
 0x49e   :  { %v1271_v46 = vpop.eup %1270  ;;  %v1087_v11 = vadd.f32 1.0, %v1269_v63  ;;  %v1105_v50 = vmul.f32 %v1092_v60, %v1588_v36  ;;  %v1107_v12 = vmul.f32 %v1092_v60, %v1594_v39 }
 0x49f   :  { %v1088_v5 = vadd.f32 1.0, %v1271_v46  ;;  %v1106_v0 = vmul.f32 %v1096_v3, %v1591_v37  ;;  %v1108_v16 = vmul.f32 %v1096_v3, %v1597_v40  ;;  %v1061_v62 = vrot.slane %v1054_v10, %v1053_v61 }
 0x4a0   :  { %v1100_v17 = vrot.slane %v1087_v11, %v1091_v52  ;;  %1113 = vst [vmem:[#allocation9] sm:$0xff] %v1105_v50  ;;  %1115 = vst [vmem:[#allocation9 + $0x10] sm:$0xff] %v1107_v12  ;;  %v1062_v7 = vcombine.high %v1269_v63, %v1271_v46 }
 0x4a1   :  { %v1104_v36 = vrot.slane %v1088_v5, %v1091_v52  ;;  %1114 = vst [vmem:[#allocation9 + $0x8] sm:$0xff] %v1106_v0  ;;  %1116 = vst [vmem:[#allocation9 + $0x18] sm:$0xff] %v1108_v16 }
 0x4a2   :  { %1083 = vst.msk [vmem:[#allocation10] sm:$0x3] %vm1841_vm11, %v1061_v62  ;;  %v1109_v39 = vmul.f32 %v1100_v17, %v1607_v4  ;;  %v1111_v37 = vmul.f32 %v1100_v17, %v1613_v44  ;;  %v1069_v40 = vrot.slane %v1062_v7, %v1053_v61 }
 0x4a3   :  { %v1110_v1 = vmul.f32 %v1104_v36, %v1610_v8  ;;  %v1112_v18 = vmul.f32 %v1104_v36, %v1616_v45 }
 0x4a4   :  { %1117 = vst [vmem:[#allocation9 + $0x20] sm:$0xff] %v1109_v39  ;;  %1119 = vst [vmem:[#allocation9 + $0x30] sm:$0xff] %v1111_v37  ;;  %v1076_v20 = vrot.slane %v1069_v40, %v1053_v61 }
 0x4a5   :  { %1118 = vst [vmem:[#allocation9 + $0x28] sm:$0xff] %v1110_v1  ;;  %1120 = vst [vmem:[#allocation9 + $0x38] sm:$0xff] %v1112_v18 }
 0x4a6   :  { %1339 = shalt.err (!%p1336_p11)
}
 0x4a7   :  { %s1340_s12 = scalar_lea.hbm %s1894_s5, 1024 }
 0x4a8   :  { %p1341_p12 = scmp.ne.s32.totalorder %s1894_s5, %s1340_s12  ;;  %p1344_p13 = scmp.lt.u32.totalorder %s1340_s12, %s1894_s5 }
 0x4aa   :  { %p1346_p0 = pnand %p1344_p13, %p1341_p12 }
 0x4ac   :  { %1349 = shalt.err (!%p1346_p0)
}
 0x4ad   :  { %1132 = dma.vmem_to_hbm [thread:$0]  %s1127_s30, 1024, %s1894_s5, [#allocation4], %s1383_s3, %s1383_s3, %s1384_s14   ;;  %1084 = vst.msk [vmem:[#allocation10 + $0x2] sm:$0x3] %vm1841_vm11, %v1076_v20 }
 0x4ae   :  { %s1350_s20 = scalar_lea.vmem %s1853_s9, 64  ;;  %p1355_p2 = scmp.lt.s32.totalorder %s1853_s9, %s1853_s9 }
 0x4af   :  { %p1351_p1 = scmp.ne.s32.totalorder %s1853_s9, %s1350_s20  ;;  %p1356_p3 = scmp.lt.s32.totalorder %s1350_s20, %s1350_s20 }
 0x4b1   :  { %p1357_p4 = por %p1356_p3, %p1355_p2 }
 0x4b3   :  { %p1358_p5 = pnand %p1357_p4, %p1351_p1 }
 0x4b5   :  { %1361 = shalt.err (!%p1358_p5)
}
 0x4b6   :  { %s1362_s22 = scalar_lea.hbm %s1896_s7, 64 }
 0x4b7   :  { %p1363_p6 = scmp.ne.s32.totalorder %s1896_s7, %s1362_s22  ;;  %p1366_p7 = scmp.lt.u32.totalorder %s1362_s22, %s1896_s7 }
 0x4b9   :  { %p1368_p8 = pnand %p1366_p7, %p1363_p6 }
 0x4bb   :  { %1371 = shalt.err (!%p1368_p8)
}
 0x4bc   :  { %s1400_s14 = smov 32   ;;  %s1401_s24 = smov 2  }
 0x4bd   :  { %1146 = dma.vmem_to_hbm [thread:$0]  %s1853_s9, 64, %s1896_s7, [#allocation11], %s1400_s14, %s1400_s14, %s1401_s24  }
 0x4be   :  { %1378 = dma.done.wait [#allocation4], 1024  }
 0x4bf   :  { %1379 = vsyncadd [#allocation4], 4294966272 }
 0x4c0   :  { %1380 = dma.done.wait [#allocation11], 64  }
 0x4c1   :  { %1381 = vsyncadd [#allocation11], 4294967232 }
 0x4c2   :  { %1155 = vsyncpa [#allocation3], 1 }
 0x4c3   :  { %1156 = vsyncpa [#allocation8], 1 }
 0x4c4   :  { %1157 = vsyncpa [#allocation4], 1 }
 0x4c5   :  { %1158 = vsyncpa [#allocation11], 1 }
 0x4c6   :  { %1159 = vsyncpa [#allocation5], 1 }

</bundles_post_ra>
